<compile_context>
chip_gen: v7x
topology: tpu7x:2x2x1
jax: 0.10.0
libtpu: 0.0.40
codegen_flags: <defaults>
</compile_context>

<pallas_src>
import jax
import jax.numpy as jnp
from jax.experimental import pallas as pl
from jax.experimental.pallas import tpu as pltpu

_HALO = 128                       # lane-aligned halo on each side of the pixel axis
_VMEM_BUDGET = 28 * 1024 * 1024   # conservative per-step budget (fits v7x's 64 MiB)


def _make_convlstm_kernel(H, W, C, NB):
    """Kernel closure over static spatial / channel / batch-block sizes."""
    HW = H * W
    K = 3
    PAD = _HALO
    assert W + 1 <= PAD, "rows wider than 127 px need spatial tiling"

    def kernel(x_ref, h_ref, c_ref, w_ref, b_ref, h_out_ref, c_out_ref, col_ref):
        # x_ref:     (NB, 4C, HW) f32   input projection term ("+ x")
        # h_ref:     (NB,  C, HW) f32   previous hidden state
        # c_ref:     (NB,  C, HW) f32   previous cell state
        # w_ref:     (4C, 9C)     bf16  conv_h2h weight, col index (dy*3+dx)*C + cin
        # b_ref:     (4C, 1)      f32   conv bias
        # h_out_ref: (NB,  C, HW) f32
        # c_out_ref: (NB,  C, HW) f32
        # col_ref:   (9C, NB*HW)  bf16  VMEM scratch: im2col^T matmul operand

        # Hoisted once per grid step (JAX does not CSE broadcast_in_dim):
        # full (C, HW) bf16 column masks for taps that would wrap across image
        # rows, and the bf16 zero halo that absorbs out-of-image row taps.
        x_pos = jax.lax.broadcasted_iota(jnp.int32, (C, HW), 1) % W
        not_left = (x_pos > 0).astype(jnp.bfloat16)         # valid when x >= 1
        not_right = (x_pos < W - 1).astype(jnp.bfloat16)    # valid when x <= W-2
        halo = jnp.zeros((C, PAD), jnp.bfloat16)

        # Build the (9C, NB*HW) im2col^T operand: for each folded batch element
        # nine lane-shifted views of its zero-haloed prev_h, packed side by
        # side on the lane axis.  Every store is a full-lane-width block.
        for b in range(NB):
            hb = h_ref[b].astype(jnp.bfloat16)                        # (C, HW)
            hp = jnp.concatenate([halo, hb, halo], axis=1)            # (C, PAD+HW+PAD)
            for dy in range(K):
                for dx in range(K):
                    tap = dy * K + dx
                    s = (dy - 1) * W + (dx - 1)        # flat pixel offset of tap
                    shifted = hp[:, PAD + s:PAD + s + HW]             # (C, HW)
                    if dx == 0:
                        shifted = shifted * not_left
                    elif dx == K - 1:
                        shifted = shifted * not_right
                    col_ref[tap * C:(tap + 1) * C, b * HW:(b + 1) * HW] = shifted

        # conv_h2h(prev_h) for all NB batch elements as one deep matmul:
        # (4C, 9C) x (9C, NB*HW) -> (4C, NB*HW), bf16 operands, f32 accumulation.
        acc = jnp.dot(w_ref[...], col_ref[...],
                      preferred_element_type=jnp.float32)
        acc = acc + b_ref[...]                       # bias added once, full width

        # LSTM gate math per folded batch element on full lane-width slabs.
        # sigmoid(x) = 0.5*(tanh(0.5*x)+1): one EUP transcendental per gate slab.
        for b in range(NB):
            a = acc[:, b * HW:(b + 1) * HW] + x_ref[b]
            i = 0.5 * (jnp.tanh(0.5 * a[0 * C:1 * C, :]) + 1.0)
            f = 0.5 * (jnp.tanh(0.5 * a[1 * C:2 * C, :]) + 1.0)
            o = 0.5 * (jnp.tanh(0.5 * a[2 * C:3 * C, :]) + 1.0)
            g = jnp.tanh(a[3 * C:4 * C, :])
            c_new = f * c_ref[b] + i * g
            c_out_ref[b] = c_new
            h_out_ref[b] = o * jnp.tanh(c_new)

    return kernel


def _vmem_step_bytes(nb, C, HW):
    """Rough per-grid-step VMEM footprint (double-buffered blocks + scratch)."""
    f32, bf16 = 4, 2
    C4 = 4 * C
    blocks = 2 * (nb * C4 * HW * f32            # x
                  + 2 * nb * C * HW * f32       # prev_h, prev_c
                  + 2 * nb * C * HW * f32       # h_out, c_out
                  + C4 * 9 * C * bf16           # weight (constant block)
                  + C4 * 128 * f32)             # bias (lane-padded)
    scratch = 9 * C * nb * HW * bf16            # im2col^T operand
    return blocks + scratch


def _pick_batch_block(N, C, HW):
    """Largest divisor of N fitting the VMEM budget; keep >= 2 grid steps when
    N >= 2 so both v7x TensorCores get work along the 'parallel' axis."""
    best = 1
    for nb in range(1, N + 1):
        if N % nb:
            continue
        if N >= 2 and N // nb < 2:
            continue
        if _vmem_step_bytes(nb, C, HW) > _VMEM_BUDGET:
            continue
        best = nb
    return best


@jax.jit
def conv_lstm_cell(x_nchw, prev_h_nchw, prev_c_nchw, weight, bias):
    """One ConvLSTMCell forward step (functional equivalent of module.forward).

    Args:
      x_nchw:      (N, 4C, H, W) float32  -- input projection term.
      prev_h_nchw: (N,  C, H, W) float32
      prev_c_nchw: (N,  C, H, W) float32
      weight:      (4C, C, 3, 3) float32  -- conv_h2h weight (OIHW).
      bias:        (4C,)         float32

    Returns:
      (h, c) each (N, C, H, W) float32.
    """
    # TODO(synk): the module's persistent prev_h/prev_c buffers and the
    # reset()/reset_all()/detach() bookkeeping are host-side state management;
    # callers thread (h, c) explicitly between steps (donate them to benefit
    # from the prev_h->h / prev_c->c output aliasing below).
    N, C4, H, W = x_nchw.shape
    C = C4 // 4
    HW = H * W
    assert C4 == 4 * C and prev_h_nchw.shape == (N, C, H, W)
    assert prev_c_nchw.shape == (N, C, H, W)
    # TODO(synk): for large images (H*W not a multiple of 128, W >= 128, or a
    # per-step footprint past the VMEM budget) add a row-tiling grid axis with
    # a 1-row halo; size tiles against v7x's 64 MiB, not 128 MiB.
    assert HW % 128 == 0 and C % 8 == 0

    NB = _pick_batch_block(N, C, HW)            # batch elements per grid step
    est = _vmem_step_bytes(NB, C, HW)
    vmem_limit = int(min(max(2 * est, 32 * 1024 * 1024), 64 * 1024 * 1024))

    # NCHW -> (N, channels, H*W): reshapes only (no transpose, no pad).
    x = x_nchw.reshape(N, C4, HW)
    hprev = prev_h_nchw.reshape(N, C, HW)
    cprev = prev_c_nchw.reshape(N, C, HW)
    # OIHW (4C, C, 3, 3) -> (4C, 9C) bf16 with column index (dy*3+dx)*C + cin.
    w_mat = jnp.transpose(weight, (0, 2, 3, 1)).reshape(C4, 9 * C)
    w_mat = w_mat.astype(jnp.bfloat16)
    b = bias.reshape(C4, 1)

    kernel = _make_convlstm_kernel(H, W, C, NB)

    # TODO(synk): mark the constant weight/bias blocks pipeline_mode=
    # pl.Buffered(1) to drop their second pipeline buffer once hidden_dim is
    # large enough for that VMEM (2 * 4C*9C*2 B) to matter.
    h_flat, c_flat = pl.pallas_call(
        kernel,
        out_shape=(
            jax.ShapeDtypeStruct((N, C, HW), jnp.float32),
            jax.ShapeDtypeStruct((N, C, HW), jnp.float32),
        ),
        grid_spec=pltpu.PrefetchScalarGridSpec(
            num_scalar_prefetch=0,
            grid=(N // NB,),
            in_specs=[
                pl.BlockSpec((NB, C4, HW), lambda n: (n, 0, 0)),
                pl.BlockSpec((NB, C, HW), lambda n: (n, 0, 0)),
                pl.BlockSpec((NB, C, HW), lambda n: (n, 0, 0)),
                pl.BlockSpec((C4, 9 * C), lambda n: (0, 0)),
                pl.BlockSpec((C4, 1), lambda n: (0, 0)),
            ],
            out_specs=[
                pl.BlockSpec((NB, C, HW), lambda n: (n, 0, 0)),
                pl.BlockSpec((NB, C, HW), lambda n: (n, 0, 0)),
            ],
            scratch_shapes=[
                pltpu.VMEM((9 * C, NB * HW), jnp.bfloat16),   # im2col^T operand
            ],
        ),
        # prev_h -> h, prev_c -> c: recurrent callers with donated state avoid
        # a fresh allocation + copy of both state tensors every timestep.
        input_output_aliases={1: 0, 2: 1},
        # Batch-block axis is independent: lets v7x shard it across both TCs.
        compiler_params=pltpu.CompilerParams(
            dimension_semantics=("parallel",),
            vmem_limit_bytes=vmem_limit),
    )(x, hprev, cprev, w_mat, b)

    h = h_flat.reshape(N, C, H, W)
    c = c_flat.reshape(N, C, H, W)
    return h, c


def conv_lstm_cell_reference(x, hprev, cprev, weight, bias):
    """Pure-JAX reference matching the PyTorch forward (NCHW)."""
    conv = jax.lax.conv_general_dilated(
        hprev, weight, window_strides=(1, 1), padding=((1, 1), (1, 1)),
        dimension_numbers=("NCHW", "OIHW", "NCHW"))
    tmp = conv + bias.reshape(1, -1, 1, 1) + x
    cc_i, cc_f, cc_o, cc_g = jnp.split(tmp, 4, axis=1)
    i = jax.nn.sigmoid(cc_i)
    f = jax.nn.sigmoid(cc_f)
    o = jax.nn.sigmoid(cc_o)
    g = jnp.tanh(cc_g)
    c = f * cprev + i * g
    h = o * jnp.tanh(c)
    return h, c


if __name__ == "__main__":
    # Shapes consistent with the module: hidden_dim=32, kernel_size=3,
    # batch=2, spatial=16x16; x must have 4*hidden_dim channels.
    N, C, H, W = 2, 32, 16, 16
    C4 = 4 * C
    K = 3

    key = jax.random.PRNGKey(0)
    kx, kw, kb, kx2 = jax.random.split(key, 4)

    x = jax.random.normal(kx, (N, C4, H, W), dtype=jnp.float32)
    # Deterministic Conv2d-style init (uniform in +/- 1/sqrt(fan_in)).
    fan_in = C * K * K
    bound = 1.0 / (fan_in ** 0.5)
    weight = jax.random.uniform(kw, (C4, C, K, K), jnp.float32, -bound, bound)
    bias = jax.random.uniform(kb, (C4,), jnp.float32, -bound, bound)

    # Step 1: the PyTorch module resets stale state to zeros of the input's
    # spatial shape before the conv -- emulate that.
    prev_h = jnp.zeros((N, C, H, W), jnp.float32)
    prev_c = jnp.zeros((N, C, H, W), jnp.float32)

    h1, c1 = conv_lstm_cell(x, prev_h, prev_c, weight, bias)
    jax.block_until_ready((h1, c1))

    # Step 2: recurrent step with non-zero state (exercises the conv path).
    x2 = jax.random.normal(kx2, (N, C4, H, W), dtype=jnp.float32)
    h2, c2 = conv_lstm_cell(x2, h1, c1, weight, bias)
    jax.block_until_ready((h2, c2))

    # Correctness check against the pure-JAX reference.  The kernel feeds the
    # MXU bf16 im2col/weight operands (f32 accumulation), so the tolerance is
    # bf16-product-level rather than 1e-4.
    r_h1, r_c1 = conv_lstm_cell_reference(x, prev_h, prev_c, weight, bias)
    r_h2, r_c2 = conv_lstm_cell_reference(x2, r_h1, r_c1, weight, bias)
    for got, want in ((h1, r_h1), (c1, r_c1), (h2, r_h2), (c2, r_c2)):
        assert jnp.allclose(got, want, atol=2e-2, rtol=2e-2), "mismatch vs reference"

    print("KERNEL_OK")
</pallas_src>

<mosaic_0001>
module attributes {stable_mosaic.version = 11 : i64} {
  func.func @kernel(%arg0: i32, %arg1: memref<1x128x256xf32, #tpu.memory_space<vmem>>, %arg2: memref<1x32x256xf32, #tpu.memory_space<vmem>>, %arg3: memref<1x32x256xf32, #tpu.memory_space<vmem>>, %arg4: memref<128x288xbf16, #tpu.memory_space<vmem>>, %arg5: memref<128x1xf32, #tpu.memory_space<vmem>>, %arg6: memref<1x32x256xf32, #tpu.memory_space<vmem>>, %arg7: memref<1x32x256xf32, #tpu.memory_space<vmem>>, %arg8: memref<288x256xbf16, #tpu.memory_space<vmem>>) attributes {dimension_semantics = [#tpu.dimension_semantics<parallel>], iteration_bounds = array<i64: 2>, scalar_prefetch = 0 : i64, scratch_operands = 1 : i64, tpu.core_type = #tpu.core_type<tc>, window_params = [{transform_indices = @transform_0, window_bounds = array<i64: 1, 128, 256>}, {transform_indices = @transform_1, window_bounds = array<i64: 1, 32, 256>}, {transform_indices = @transform_2, window_bounds = array<i64: 1, 32, 256>}, {pipeline_mode = #tpu.pipeline_mode<synchronous>, transform_indices = @transform_3, window_bounds = array<i64: 128, 288>}, {pipeline_mode = #tpu.pipeline_mode<synchronous>, transform_indices = @transform_4, window_bounds = array<i64: 128, 1>}, {transform_indices = @transform_5, window_bounds = array<i64: 1, 32, 256>}, {transform_indices = @transform_6, window_bounds = array<i64: 1, 32, 256>}]} {
    %0 = tpu.iota {dimensions = array<i32: 1>} : vector<32x256xi32>
    %c16_i32 = arith.constant 16 : i32
    %c0_i32 = arith.constant 0 : i32
    %1 = arith.cmpi eq, %c16_i32, %c0_i32 : i32
    %c1_i32 = arith.constant 1 : i32
    %2 = arith.select %1, %c1_i32, %c16_i32 : i32
    %3 = vector.broadcast %2 : i32 to vector<32x256xi32>
    %4 = arith.remsi %0, %3 : vector<32x256xi32>
    %c0_i32_0 = arith.constant 0 : i32
    %5 = vector.broadcast %c0_i32_0 : i32 to vector<32x256xi32>
    %6 = arith.cmpi ne, %4, %5 : vector<32x256xi32>
    %c0_i32_1 = arith.constant 0 : i32
    %7 = vector.broadcast %c0_i32_1 : i32 to vector<32x256xi32>
    %8 = arith.cmpi slt, %4, %7 : vector<32x256xi32>
    %c0_i32_2 = arith.constant 0 : i32
    %9 = arith.cmpi slt, %2, %c0_i32_2 : i32
    %10 = vector.broadcast %9 : i1 to vector<32x256xi1>
    %11 = vector.broadcast %10 : vector<32x256xi1> to vector<32x256xi1>
    %12 = arith.xori %8, %11 : vector<32x256xi1>
    %13 = arith.andi %12, %6 : vector<32x256xi1>
    %14 = vector.broadcast %2 : i32 to vector<32x256xi32>
    %15 = arith.addi %4, %14 : vector<32x256xi32>
    %16 = arith.select %13, %15, %4 : vector<32x256xi1>, vector<32x256xi32>
    %c0_i32_3 = arith.constant 0 : i32
    %17 = vector.broadcast %c0_i32_3 : i32 to vector<32x256xi32>
    %18 = arith.cmpi sgt, %16, %17 : vector<32x256xi32>
    %19 = arith.extui %18 : vector<32x256xi1> to vector<32x256xi32>
    %20 = arith.sitofp %19 : vector<32x256xi32> to vector<32x256xf32>
    %21 = arith.truncf %20 : vector<32x256xf32> to vector<32x256xbf16>
    %c15_i32 = arith.constant 15 : i32
    %22 = vector.broadcast %c15_i32 : i32 to vector<32x256xi32>
    %23 = arith.cmpi slt, %16, %22 : vector<32x256xi32>
    %24 = arith.extui %23 : vector<32x256xi1> to vector<32x256xi32>
    %25 = arith.sitofp %24 : vector<32x256xi32> to vector<32x256xf32>
    %26 = arith.truncf %25 : vector<32x256xf32> to vector<32x256xbf16>
    %cst = arith.constant 0.000000e+00 : bf16
    %27 = vector.broadcast %cst : bf16 to vector<32x128xbf16>
    %c0 = arith.constant 0 : index
    %c0_4 = arith.constant 0 : index
    %c0_5 = arith.constant 0 : index
    %28 = vector.load %arg2[%c0, %c0_4, %c0_5] : memref<1x32x256xf32, #tpu.memory_space<vmem>>, vector<1x32x256xf32>
    %29 = vector.shape_cast %28 : vector<1x32x256xf32> to vector<32x256xf32>
    %30 = arith.truncf %29 : vector<32x256xf32> to vector<32x256xbf16>
    %31 = tpu.concatenate %27, %30, %27 in 1 : vector<32x128xbf16>, vector<32x256xbf16>, vector<32x128xbf16> -> vector<32x512xbf16>
    %32 = vector.extract_strided_slice %31 {offsets = [0, 111], sizes = [32, 256], strides = [1, 1]} : vector<32x512xbf16> to vector<32x256xbf16>
    %33 = arith.mulf %32, %21 : vector<32x256xbf16>
    %c0_6 = arith.constant 0 : index
    %c0_7 = arith.constant 0 : index
    %34 = vector.load %arg8[%c0_6, %c0_7] : memref<288x256xbf16, #tpu.memory_space<vmem>>, vector<32x256xbf16>
    tpu.vector_store %arg8[%c0_6, %c0_7], %33 {strides = array<i32>} : memref<288x256xbf16, #tpu.memory_space<vmem>>, vector<32x256xbf16>,
    %35 = vector.extract_strided_slice %31 {offsets = [0, 112], sizes = [32, 256], strides = [1, 1]} : vector<32x512xbf16> to vector<32x256xbf16>
    %c32 = arith.constant 32 : index
    %c0_8 = arith.constant 0 : index
    %36 = vector.load %arg8[%c32, %c0_8] : memref<288x256xbf16, #tpu.memory_space<vmem>>, vector<32x256xbf16>
    tpu.vector_store %arg8[%c32, %c0_8], %35 {strides = array<i32>} : memref<288x256xbf16, #tpu.memory_space<vmem>>, vector<32x256xbf16>,
    %37 = vector.extract_strided_slice %31 {offsets = [0, 113], sizes = [32, 256], strides = [1, 1]} : vector<32x512xbf16> to vector<32x256xbf16>
    %38 = arith.mulf %37, %26 : vector<32x256xbf16>
    %c64 = arith.constant 64 : index
    %c0_9 = arith.constant 0 : index
    %39 = vector.load %arg8[%c64, %c0_9] : memref<288x256xbf16, #tpu.memory_space<vmem>>, vector<32x256xbf16>
    tpu.vector_store %arg8[%c64, %c0_9], %38 {strides = array<i32>} : memref<288x256xbf16, #tpu.memory_space<vmem>>, vector<32x256xbf16>,
    %40 = vector.extract_strided_slice %31 {offsets = [0, 127], sizes = [32, 256], strides = [1, 1]} : vector<32x512xbf16> to vector<32x256xbf16>
    %41 = arith.mulf %40, %21 : vector<32x256xbf16>
    %c96 = arith.constant 96 : index
    %c0_10 = arith.constant 0 : index
    %42 = vector.load %arg8[%c96, %c0_10] : memref<288x256xbf16, #tpu.memory_space<vmem>>, vector<32x256xbf16>
    tpu.vector_store %arg8[%c96, %c0_10], %41 {strides = array<i32>} : memref<288x256xbf16, #tpu.memory_space<vmem>>, vector<32x256xbf16>,
    %43 = vector.extract_strided_slice %31 {offsets = [0, 128], sizes = [32, 256], strides = [1, 1]} : vector<32x512xbf16> to vector<32x256xbf16>
    %c128 = arith.constant 128 : index
    %c0_11 = arith.constant 0 : index
    %44 = vector.load %arg8[%c128, %c0_11] : memref<288x256xbf16, #tpu.memory_space<vmem>>, vector<32x256xbf16>
    tpu.vector_store %arg8[%c128, %c0_11], %43 {strides = array<i32>} : memref<288x256xbf16, #tpu.memory_space<vmem>>, vector<32x256xbf16>,
    %45 = vector.extract_strided_slice %31 {offsets = [0, 129], sizes = [32, 256], strides = [1, 1]} : vector<32x512xbf16> to vector<32x256xbf16>
    %46 = arith.mulf %45, %26 : vector<32x256xbf16>
    %c160 = arith.constant 160 : index
    %c0_12 = arith.constant 0 : index
    %47 = vector.load %arg8[%c160, %c0_12] : memref<288x256xbf16, #tpu.memory_space<vmem>>, vector<32x256xbf16>
    tpu.vector_store %arg8[%c160, %c0_12], %46 {strides = array<i32>} : memref<288x256xbf16, #tpu.memory_space<vmem>>, vector<32x256xbf16>,
    %48 = vector.extract_strided_slice %31 {offsets = [0, 143], sizes = [32, 256], strides = [1, 1]} : vector<32x512xbf16> to vector<32x256xbf16>
    %49 = arith.mulf %48, %21 : vector<32x256xbf16>
    %c192 = arith.constant 192 : index
    %c0_13 = arith.constant 0 : index
    %50 = vector.load %arg8[%c192, %c0_13] : memref<288x256xbf16, #tpu.memory_space<vmem>>, vector<32x256xbf16>
    tpu.vector_store %arg8[%c192, %c0_13], %49 {strides = array<i32>} : memref<288x256xbf16, #tpu.memory_space<vmem>>, vector<32x256xbf16>,
    %51 = vector.extract_strided_slice %31 {offsets = [0, 144], sizes = [32, 256], strides = [1, 1]} : vector<32x512xbf16> to vector<32x256xbf16>
    %c224 = arith.constant 224 : index
    %c0_14 = arith.constant 0 : index
    %52 = vector.load %arg8[%c224, %c0_14] : memref<288x256xbf16, #tpu.memory_space<vmem>>, vector<32x256xbf16>
    tpu.vector_store %arg8[%c224, %c0_14], %51 {strides = array<i32>} : memref<288x256xbf16, #tpu.memory_space<vmem>>, vector<32x256xbf16>,
    %53 = vector.extract_strided_slice %31 {offsets = [0, 145], sizes = [32, 256], strides = [1, 1]} : vector<32x512xbf16> to vector<32x256xbf16>
    %54 = arith.mulf %53, %26 : vector<32x256xbf16>
    %c256 = arith.constant 256 : index
    %c0_15 = arith.constant 0 : index
    %55 = vector.load %arg8[%c256, %c0_15] : memref<288x256xbf16, #tpu.memory_space<vmem>>, vector<32x256xbf16>
    tpu.vector_store %arg8[%c256, %c0_15], %54 {strides = array<i32>} : memref<288x256xbf16, #tpu.memory_space<vmem>>, vector<32x256xbf16>,
    %c0_16 = arith.constant 0 : index
    %c0_17 = arith.constant 0 : index
    %56 = vector.load %arg4[%c0_16, %c0_17] : memref<128x288xbf16, #tpu.memory_space<vmem>>, vector<128x288xbf16>
    %c0_18 = arith.constant 0 : index
    %c0_19 = arith.constant 0 : index
    %57 = vector.load %arg8[%c0_18, %c0_19] : memref<288x256xbf16, #tpu.memory_space<vmem>>, vector<288x256xbf16>
    %cst_20 = arith.constant dense<0.000000e+00> : vector<128x256xf32>
    %58 = tpu.matmul %56, %57, %cst_20 {dimension_numbers = #tpu.dot_dimension_numbers<[1], [0], [0], [1], [0, 0, 1, 1], [], []>} : vector<128x288xbf16>, vector<288x256xbf16>, vector<128x256xf32> -> vector<128x256xf32>
    %c0_21 = arith.constant 0 : index
    %c0_22 = arith.constant 0 : index
    %59 = vector.load %arg5[%c0_21, %c0_22] : memref<128x1xf32, #tpu.memory_space<vmem>>, vector<128x1xf32>
    %60 = vector.broadcast %59 : vector<128x1xf32> to vector<128x256xf32>
    %61 = arith.addf %58, %60 : vector<128x256xf32>
    %c0_23 = arith.constant 0 : index
    %c0_24 = arith.constant 0 : index
    %c0_25 = arith.constant 0 : index
    %62 = vector.load %arg1[%c0_23, %c0_24, %c0_25] : memref<1x128x256xf32, #tpu.memory_space<vmem>>, vector<1x128x256xf32>
    %63 = vector.shape_cast %62 : vector<1x128x256xf32> to vector<128x256xf32>
    %64 = arith.addf %61, %63 : vector<128x256xf32>
    %65 = vector.extract_strided_slice %64 {offsets = [0, 0], sizes = [32, 256], strides = [1, 1]} : vector<128x256xf32> to vector<32x256xf32>
    %cst_26 = arith.constant 5.000000e-01 : f32
    %66 = vector.broadcast %cst_26 : f32 to vector<32x256xf32>
    %67 = arith.mulf %66, %65 : vector<32x256xf32>
    %68 = math.tanh %67 : vector<32x256xf32>
    %cst_27 = arith.constant 1.000000e+00 : f32
    %69 = vector.broadcast %cst_27 : f32 to vector<32x256xf32>
    %70 = arith.addf %68, %69 : vector<32x256xf32>
    %cst_28 = arith.constant 5.000000e-01 : f32
    %71 = vector.broadcast %cst_28 : f32 to vector<32x256xf32>
    %72 = arith.mulf %71, %70 : vector<32x256xf32>
    %73 = vector.extract_strided_slice %64 {offsets = [32, 0], sizes = [32, 256], strides = [1, 1]} : vector<128x256xf32> to vector<32x256xf32>
    %cst_29 = arith.constant 5.000000e-01 : f32
    %74 = vector.broadcast %cst_29 : f32 to vector<32x256xf32>
    %75 = arith.mulf %74, %73 : vector<32x256xf32>
    %76 = math.tanh %75 : vector<32x256xf32>
    %cst_30 = arith.constant 1.000000e+00 : f32
    %77 = vector.broadcast %cst_30 : f32 to vector<32x256xf32>
    %78 = arith.addf %76, %77 : vector<32x256xf32>
    %cst_31 = arith.constant 5.000000e-01 : f32
    %79 = vector.broadcast %cst_31 : f32 to vector<32x256xf32>
    %80 = arith.mulf %79, %78 : vector<32x256xf32>
    %81 = vector.extract_strided_slice %64 {offsets = [64, 0], sizes = [32, 256], strides = [1, 1]} : vector<128x256xf32> to vector<32x256xf32>
    %cst_32 = arith.constant 5.000000e-01 : f32
    %82 = vector.broadcast %cst_32 : f32 to vector<32x256xf32>
    %83 = arith.mulf %82, %81 : vector<32x256xf32>
    %84 = math.tanh %83 : vector<32x256xf32>
    %cst_33 = arith.constant 1.000000e+00 : f32
    %85 = vector.broadcast %cst_33 : f32 to vector<32x256xf32>
    %86 = arith.addf %84, %85 : vector<32x256xf32>
    %cst_34 = arith.constant 5.000000e-01 : f32
    %87 = vector.broadcast %cst_34 : f32 to vector<32x256xf32>
    %88 = arith.mulf %87, %86 : vector<32x256xf32>
    %89 = vector.extract_strided_slice %64 {offsets = [96, 0], sizes = [32, 256], strides = [1, 1]} : vector<128x256xf32> to vector<32x256xf32>
    %90 = math.tanh %89 : vector<32x256xf32>
    %c0_35 = arith.constant 0 : index
    %c0_36 = arith.constant 0 : index
    %c0_37 = arith.constant 0 : index
    %91 = vector.load %arg3[%c0_35, %c0_36, %c0_37] : memref<1x32x256xf32, #tpu.memory_space<vmem>>, vector<1x32x256xf32>
    %92 = vector.shape_cast %91 : vector<1x32x256xf32> to vector<32x256xf32>
    %93 = arith.mulf %80, %92 : vector<32x256xf32>
    %94 = arith.mulf %72, %90 : vector<32x256xf32>
    %95 = arith.addf %93, %94 : vector<32x256xf32>
    %c0_38 = arith.constant 0 : index
    %c0_39 = arith.constant 0 : index
    %c0_40 = arith.constant 0 : index
    %96 = vector.load %arg7[%c0_38, %c0_39, %c0_40] : memref<1x32x256xf32, #tpu.memory_space<vmem>>, vector<1x32x256xf32>
    %97 = vector.shape_cast %96 : vector<1x32x256xf32> to vector<32x256xf32>
    %98 = vector.shape_cast %95 : vector<32x256xf32> to vector<1x32x256xf32>
    tpu.vector_store %arg7[%c0_38, %c0_39, %c0_40], %98 {strides = array<i32>} : memref<1x32x256xf32, #tpu.memory_space<vmem>>, vector<1x32x256xf32>,
    %99 = math.tanh %95 : vector<32x256xf32>
    %100 = arith.mulf %88, %99 : vector<32x256xf32>
    %c0_41 = arith.constant 0 : index
    %c0_42 = arith.constant 0 : index
    %c0_43 = arith.constant 0 : index
    %101 = vector.load %arg6[%c0_41, %c0_42, %c0_43] : memref<1x32x256xf32, #tpu.memory_space<vmem>>, vector<1x32x256xf32>
    %102 = vector.shape_cast %101 : vector<1x32x256xf32> to vector<32x256xf32>
    %103 = vector.shape_cast %100 : vector<32x256xf32> to vector<1x32x256xf32>
    tpu.vector_store %arg6[%c0_41, %c0_42, %c0_43], %103 {strides = array<i32>} : memref<1x32x256xf32, #tpu.memory_space<vmem>>, vector<1x32x256xf32>,
    return
  }
  func.func @transform_0(%arg0: i32) -> (i32, i32, i32) {
    %c0_i32 = arith.constant 0 : i32
    %c0_i32_0 = arith.constant 0 : i32
    %c0_i32_1 = arith.constant 0 : i32
    return %arg0, %c0_i32, %c0_i32_0 : i32, i32, i32
  }
  func.func @transform_1(%arg0: i32) -> (i32, i32, i32) {
    %c0_i32 = arith.constant 0 : i32
    %c0_i32_0 = arith.constant 0 : i32
    %c0_i32_1 = arith.constant 0 : i32
    return %arg0, %c0_i32, %c0_i32_0 : i32, i32, i32
  }
  func.func @transform_2(%arg0: i32) -> (i32, i32, i32) {
    %c0_i32 = arith.constant 0 : i32
    %c0_i32_0 = arith.constant 0 : i32
    %c0_i32_1 = arith.constant 0 : i32
    return %arg0, %c0_i32, %c0_i32_0 : i32, i32, i32
  }
  func.func @transform_3(%arg0: i32) -> (i32, i32) {
    %c0_i32 = arith.constant 0 : i32
    %c0_i32_0 = arith.constant 0 : i32
    %c0_i32_1 = arith.constant 0 : i32
    return %c0_i32, %c0_i32_0 : i32, i32
  }
  func.func @transform_4(%arg0: i32) -> (i32, i32) {
    %c0_i32 = arith.constant 0 : i32
    %c0_i32_0 = arith.constant 0 : i32
    %c0_i32_1 = arith.constant 0 : i32
    return %c0_i32, %c0_i32_0 : i32, i32
  }
  func.func @transform_5(%arg0: i32) -> (i32, i32, i32) {
    %c0_i32 = arith.constant 0 : i32
    %c0_i32_0 = arith.constant 0 : i32
    %c0_i32_1 = arith.constant 0 : i32
    return %arg0, %c0_i32, %c0_i32_0 : i32, i32, i32
  }
  func.func @transform_6(%arg0: i32) -> (i32, i32, i32) {
    %c0_i32 = arith.constant 0 : i32
    %c0_i32_0 = arith.constant 0 : i32
    %c0_i32_1 = arith.constant 0 : i32
    return %arg0, %c0_i32, %c0_i32_0 : i32, i32, i32
  }
}

</mosaic_0001>

<bundles_post_ra>
// kernel: conv_lstm_cell.1
= control target key start
LH: loop header
LB: loop body
LE: loop exit
PB: predicated region body
PF: predicated region fallthrough
CT: control target
= control target key end

     0   :  { %s1852_s21 = smov 0   ;;  %s2305_s0 = inlined_call_operand.vmem [shape: f32[2,128,256], index: 0, kind: input, shape index: {}]   ;;  %s2306_s1 = inlined_call_operand.vmem [shape: f32[2,32,256], index: 1, kind: input, shape index: {}, may-alias: {1,5}]   ;;  %s2307_s2 = inlined_call_operand.vmem [shape: f32[2,32,256], index: 2, kind: input, shape index: {}, may-alias: {2,6}]   ;;  %s2308_s3 = inlined_call_operand.vmem [shape: bf16[128,288], index: 3, kind: input, shape index: {}]   ;;  %s2309_s4 = inlined_call_operand.vmem [shape: f32[128,1], index: 4, kind: input, shape index: {}]   ;;  %s2310_s5 = inlined_call_operand.vmem [shape: f32[2,32,256], index: 5, kind: output, shape index: {0}, may-alias: {1,5}]   ;;  %s2311_s6 = inlined_call_operand.vmem [shape: f32[2,32,256], index: 6, kind: output, shape index: {1}, may-alias: {2,6}]  }
   0x1 LB: > { %s1545_s22 = sadd.s32 4294967295, %s1805_s21   ;;  %p1549_p0 = scmp.ge.s32.totalorder %s1805_s21, 1  ;;  %s1805_s21 = sphi %s1852_s21, %s17_s21  }
   0x2   : > { %p235_p1 = scmp.lt.s32.totalorder %s1805_s21, 3 }
   0x4   : > { %p236_p2 = pnand %p1549_p0, %p235_p1 }
   0x5   : > { %v306_v0 = vlaneseq (!%p236_p2)  ;;  %v1807_v1 = vmov (!%p236_p2), 0   ;;  %v1808_v6 = vmov (!%p236_p2), 0.0   ;;  %s1809_s23 = smov (!%p236_p2), 111   ;;  %s1810_s24 = smov (!%p236_p2), 113   ;;  %vm367_vm4 = vcmask (!%p236_p2), 908288  }
   0x6   : > { %239 = sbr.rel (%p236_p2) target bundleno = 628 (0x274), region = 40  ;;  %1120 = vmatprep.mubr.bf16.mxu0 (!%p236_p2), %v1807_v1  ;;  %1686 = vset.pattern.permute.xlu1 (!%p236_p2), %v1807_v1  ;;  %p280_p3 = scmp.lt.s32.totalorder (!%p236_p2), %s1545_s22, 1  ;;  %vm439_vm5 = vcmask (!%p236_p2), 924672   ;;  %vm481_vm6 = vcmask (!%p236_p2), 1039360   ;;  %vm506_vm7 = vcmask (!%p236_p2), 7168   ;;  %vm464_vm8 = vcmask (!%p236_p2), 121856  }
   0x7   : > { %v307_v2 = vand.u32 (!%p236_p2), 127, %v306_v0  ;;  %1685 = vset.pattern.permute.xlu0 (!%p236_p2), %v1807_v1  ;;  %s1811_s25 = smov (!%p236_p2), 127   ;;  %s1812_s27 = smov (!%p236_p2), 1   ;;  %vm392_vm9 = vcmask (!%p236_p2), 138240   ;;  %vm420_vm10 = vcmask (!%p236_p2), 130048   ;;  %vm613_vm11 = vcmask (!%p236_p2), 916480  }
   0x8   : > { %s1813_s7 = smov (!%p236_p2), 15   ;;  %s1814_s8 = smov (!%p236_p2), 17   ;;  %vm950_vm12 = vcmask (!%p236_p2), 261120  }
   0x9   : > { %v313_v3 = vand.u32 (!%p236_p2), 15, %v307_v2  ;;  %v308_v4 = vadd.s32 (!%p236_p2), 128, %v307_v2  ;;  %s1815_s9 = smov (!%p236_p2), 16   ;;  %s1816_s10 = smov (!%p236_p2), 112  }
   0xb   : > { %vm333_vm0 = vcmp.gt.s32.totalorder (!%p236_p2), %v313_v3, 0  ;;  %v320_v5 = vand.u32 (!%p236_p2), 15, %v308_v4  ;;  %vm341_vm1 = vcmp.lt.s32.totalorder (!%p236_p2), %v313_v3, 15 }
   0xc   : > { %v1560_v7 = vsel (!%p236_p2), %vm333_vm0, 1.0, %v1808_v6  ;;  %v1562_v8 = vsel (!%p236_p2), %vm341_vm1, 1.0, %v1808_v6 }
   0xd   : > { %v339_v9 = vpack.c.bf16 %v1560_v7, %v1560_v7  ;;  %vm334_vm2 = vcmp.gt.s32.totalorder %v320_v5, 0  ;;  %v347_v10 = vpack.c.bf16 %v1562_v8, %v1562_v8  ;;  %vm342_vm3 = vcmp.lt.s32.totalorder %v320_v5, 15  ;;  %s2313_s22 = smov (!%p280_p3, %s1545_s22), 1 }
   0xe   : > { %v1561_v11 = vsel %vm334_vm2, 1.0, %v1808_v6  ;;  %v1563_v12 = vsel %vm342_vm3, 1.0, %v1808_v6  ;;  %s1876_s26 = sshll.u32 %s2313_s22, 6  ;;  %v1689_v6 = vld [vmem:[%s2308_s3 + $0x4] ss:$12 sps:$4 sm:$0xff]  }
   0xf   : > { %363 = vrot.lane.b32.xlu0 %v339_v9, %s1809_s23  ;;  %v340_v13 = vpack.c.bf16 %v1561_v11, %v1561_v11  ;;  %435 = vrot.lane.b32.xlu1 %v347_v10, %s1810_s24  ;;  %v348_v14 = vpack.c.bf16 %v1563_v12, %v1563_v12  ;;  %s289_s30 = scalar_lea.vmem %s2306_s1, %s1876_s26  ;;  %s2243_s12 = scalar_lea.vmem %s2307_s2, %s1876_s26 }
  0x10   : > { %v349_v15 = vld [vmem:[%s289_s30] sm:$0xff]  ;;  %v351_v16 = vld [vmem:[%s289_s30 + $0x10] sm:$0xff]  ;;  %v350_v17 = vld [vmem:[%s289_s30 + $0x8] sm:$0xff]  ;;  %1007 = vmatprep.mubr.bf16.mxu1 %v1689_v6  ;;  %s2267_s15 = scalar_lea.vmem %s2311_s6, %s1876_s26  ;;  %s2291_s18 = scalar_lea.vmem %s2310_s5, %s1876_s26 }
  0x11   : > { %v352_v18 = vld [vmem:[%s289_s30 + $0x18] sm:$0xff]  ;;  %v1888_v19 = vpack.c.bf16 %v351_v16, %v349_v15  ;;  %v354_v21 = vld [vmem:[%s289_s30 + $0x28] sm:$0xff]  ;;  %v353_v30 = vld [vmem:[%s289_s30 + $0x20] sm:$0xff] }
  0x12   : > { %v1890_v20 = vpack.c.bf16 %v352_v18, %v350_v17  ;;  %v356_v22 = vld [vmem:[%s289_s30 + $0x38] sm:$0xff]  ;;  %v355_v31 = vld [vmem:[%s289_s30 + $0x30] sm:$0xff] }
  0x13   : > { %365 = vrot.lane.b32.xlu0 %v340_v13, %s1809_s23  ;;  %437 = vrot.lane.b32.xlu1 %v348_v14, %s1810_s24  ;;  %v1895_v25 = vpack.c.bf16 %v356_v22, %v354_v21  ;;  %v1904_v34 = vpack.c.bf16 %v355_v31, %v353_v30  ;;  %v735_v21 = vld [vmem:[%s2309_s4 + $0x8] sm:$0xff]  ;;  %v734_v22 = vld [vmem:[%s2309_s4] sm:$0xff] }
  0x17   : > { %477 = vrot.lane.b32.xlu0 %v339_v9, %s1811_s25  ;;  %479 = vrot.lane.b32.xlu1 %v340_v13, %s1811_s25 }
  0x1b   : > { %525 = vrot.lane.b32.xlu1 %v348_v14, %s1812_s27  ;;  %523 = vrot.lane.b32.xlu0 %v347_v10, %s1812_s27 }
  0x1f   : > { %563 = vrot.lane.b32.xlu0 %v339_v9, %s1813_s7  ;;  %565 = vrot.lane.b32.xlu1 %v340_v13, %s1813_s7 }
  0x23   : > { %626 = vrot.lane.b32.xlu0 %v347_v10, %s1814_s8  ;;  %628 = vrot.lane.b32.xlu1 %v348_v14, %s1814_s8 }
  0x27   : > { %412 = vrot.lane.b32.xlu1 %v1888_v19, %s1815_s9  ;;  %414 = vrot.lane.b32.xlu0 %v1890_v20, %s1815_s9 }
  0x2b   : > { %410 = vrot.lane.b32.xlu1 %v1807_v1, %s1815_s9 }
  0x81   : > { %v364_v23 = vpop.permute.xlu0 %363  ;;  %v436_v32 = vpop.permute.xlu1 %435 }
  0x82   : > { %v372_v24 = vmul.bf16 0, %v364_v23  ;;  %v444_v39 = vmul.bf16 0, %v436_v32 }
  0x84   : > { %382 = vrot.lane.b32.xlu0 %v372_v24, %s1814_s8 }
  0x85   : > { %v366_v26 = vpop.permute.xlu0 %365  ;;  %v438_v36 = vpop.permute.xlu1 %437 }
  0x86   : > { %v374_v27 = vmul.bf16 %v366_v26, %v1890_v20  ;;  %v376_v28 = vmul.bf16 %v366_v26, %v1895_v25  ;;  %v368_v29 = vsel %vm367_vm4, %v364_v23, %v366_v26  ;;  %v446_v37 = vmul.bf16 %v438_v36, %v1890_v20  ;;  %v736_v26 = vld [vmem:[%s2309_s4 + $0x10] sm:$0xff] }
  0x87   : > { %v373_v33 = vmul.bf16 %v368_v29, %v1888_v19  ;;  %v375_v35 = vmul.bf16 %v368_v29, %v1904_v34  ;;  %v448_v41 = vmul.bf16 %v438_v36, %v1895_v25  ;;  %v440_v42 = vsel %vm439_vm5, %v436_v32, %v438_v36  ;;  %v737_v29 = vld [vmem:[%s2309_s4 + $0x18] sm:$0xff]  ;;  %v738_v32 = vld [vmem:[%s2309_s4 + $0x20] sm:$0xff]  ;;  %v739_v36 = vld [vmem:[%s2309_s4 + $0x28] sm:$0xff] }
  0x88   : > { %390 = vrot.lane.b32.xlu0 %v376_v28, %s1814_s8  ;;  %386 = vrot.lane.b32.xlu1 %v374_v27, %s1814_s8  ;;  %v445_v45 = vmul.bf16 %v440_v42, %v1888_v19  ;;  %v447_v48 = vmul.bf16 %v440_v42, %v1904_v34 }
  0x89   : > { %v478_v38 = vpop.permute.xlu0 %477  ;;  %v480_v43 = vpop.permute.xlu1 %479 }
  0x8a   : > { %v486_v40 = vmul.bf16 0, %v478_v38  ;;  %v490_v44 = vmul.bf16 %v480_v43, %v1895_v25  ;;  %v488_v47 = vmul.bf16 %v480_v43, %v1890_v20  ;;  %v482_v49 = vsel %vm481_vm6, %v478_v38, %v480_v43 }
  0x8b   : > { %v487_v51 = vmul.bf16 %v482_v49, %v1888_v19  ;;  %v489_v55 = vmul.bf16 %v482_v49, %v1904_v34 }
  0x8c   : > { %418 = vrot.lane.b32.xlu1 %v1895_v25, %s1815_s9  ;;  %384 = vrot.lane.b32.xlu0 %v373_v33, %s1814_s8 }
  0x8d   : > { %v524_v46 = vpop.permute.xlu0 %523  ;;  %v526_v52 = vpop.permute.xlu1 %525 }
  0x8e   : > { %v531_v50 = vmul.bf16 %v524_v46, %v1888_v19  ;;  %v533_v53 = vmul.bf16 0, %v526_v52  ;;  %v534_v57 = vmul.bf16 %v524_v46, %v1904_v34  ;;  %v527_v61 = vsel %vm506_vm7, %v524_v46, %v526_v52  ;;  %v746_v46 = vld [vmem:[%s2309_s4 + $0x60] sm:$0xff] }
  0x8f   : > { %v532_v62 = vmul.bf16 %v527_v61, %v1890_v20  ;;  %v535_v63 = vmul.bf16 %v527_v61, %v1895_v25 }
  0x90   : > { %388 = vrot.lane.b32.xlu1 %v375_v35, %s1814_s8  ;;  %416 = vrot.lane.b32.xlu0 %v1904_v34, %s1815_s9 }
  0x91   : > { %v564_v54 = vpop.permute.xlu0 %563  ;;  %v566_v58 = vpop.permute.xlu1 %565 }
  0x92   : > { %v571_v56 = vmul.bf16 %v564_v54, %v1888_v19  ;;  %v573_v59 = vmul.bf16 0, %v566_v58  ;;  %v574_v60 = vmul.bf16 %v564_v54, %v1904_v34  ;;  %v567_v0 = vsel %vm464_vm8, %v564_v54, %v566_v58  ;;  %v749_v54 = vld [vmem:[%s2309_s4 + $0x78] sm:$0xff] }
  0x93   : > { %v572_v3 = vmul.bf16 %v567_v0, %v1890_v20  ;;  %v575_v7 = vmul.bf16 %v567_v0, %v1895_v25 }
  0x94   : > { %458 = vrot.lane.b32.xlu1 %v446_v37, %s1813_s7  ;;  %454 = vrot.lane.b32.xlu0 %v444_v39, %s1813_s7 }
  0x95   : > { %v627_v2 = vpop.permute.xlu0 %626  ;;  %v629_v5 = vpop.permute.xlu1 %628 }
  0x96   : > { %v634_v4 = vmul.bf16 %v627_v2, %v1888_v19  ;;  %v630_v8 = vsel %vm392_vm9, %v627_v2, %v629_v5  ;;  %v636_v9 = vmul.bf16 0, %v629_v5  ;;  %v637_v11 = vmul.bf16 %v627_v2, %v1904_v34 }
  0x97   : > { %v635_v10 = vmul.bf16 %v630_v8, %v1890_v20  ;;  %v638_v12 = vmul.bf16 %v630_v8, %v1895_v25 }
  0x98   : > { %496 = vrot.lane.b32.xlu1 %v486_v40, %s1812_s27  ;;  %462 = vrot.lane.b32.xlu0 %v448_v41, %s1813_s7  ;;  %v740_v40 = vld [vmem:[%s2309_s4 + $0x30] sm:$0xff]  ;;  %v741_v41 = vld [vmem:[%s2309_s4 + $0x38] sm:$0xff] }
  0x99   : > { %v413_v13 = vpop.permute.xlu1 %412  ;;  %v415_v14 = vpop.permute.xlu0 %414 }
  0x9a   : > { %v422_v37 = vsel %vm420_vm10, %v413_v13, %v415_v14 }
  0x9c   : > { %504 = vrot.lane.b32.xlu1 %v490_v44, %s1812_s27  ;;  %456 = vrot.lane.b32.xlu0 %v445_v45, %s1813_s7 }
  0x9d   : > { %v411_v15 = vpop.permute.xlu1 %410 }
  0x9e   : > { %v421_v42 = vsel %vm420_vm10, %v411_v15, %v413_v13 }
  0xa0   : > { %460 = vrot.lane.b32.xlu1 %v447_v48, %s1813_s7  ;;  %500 = vrot.lane.b32.xlu0 %v488_v47, %s1812_s27  ;;  %v747_v47 = vld [vmem:[%s2309_s4 + $0x68] sm:$0xff]  ;;  %s1598_s7 = sshll.u32 %s2313_s22, 8 }
  0xa4   : > { %498 = vrot.lane.b32.xlu1 %v487_v51, %s1812_s27  ;;  %541 = vrot.lane.b32.xlu0 %v531_v50, %s1811_s25  ;;  %v748_v51 = vld [vmem:[%s2309_s4 + $0x70] sm:$0xff] }
  0xa8   : > { %545 = vrot.lane.b32.xlu1 %v533_v53, %s1811_s25  ;;  %502 = vrot.lane.b32.xlu0 %v489_v55, %s1812_s27 }
  0xac   : > { %581 = vrot.lane.b32.xlu1 %v571_v56, %s1810_s24  ;;  %547 = vrot.lane.b32.xlu0 %v534_v57, %s1811_s25  ;;  %v742_v57 = vld [vmem:[%s2309_s4 + $0x40] sm:$0xff] }
  0xb0   : > { %587 = vrot.lane.b32.xlu1 %v574_v60, %s1810_s24  ;;  %585 = vrot.lane.b32.xlu0 %v573_v59, %s1810_s24  ;;  %v743_v60 = vld [vmem:[%s2309_s4 + $0x48] sm:$0xff] }
  0xb4   : > { %607 = vrot.lane.b32.xlu1 %v1807_v1, %s1816_s10  ;;  %543 = vrot.lane.b32.xlu0 %v532_v62, %s1811_s25 }
  0xb8   : > { %549 = vrot.lane.b32.xlu1 %v535_v63, %s1811_s25  ;;  %605 = vrot.lane.b32.xlu0 %v1890_v20, %s1816_s10  ;;  %v744_v63 = vld [vmem:[%s2309_s4 + $0x50] sm:$0xff] }
  0xbc   : > { %583 = vrot.lane.b32.xlu1 %v572_v3, %s1810_s24  ;;  %603 = vrot.lane.b32.xlu0 %v1888_v19, %s1816_s10  ;;  %v745_v3 = vld [vmem:[%s2309_s4 + $0x58] sm:$0xff] }
  0xc0   : > { %644 = vrot.lane.b32.xlu1 %v634_v4, %s1809_s23  ;;  %589 = vrot.lane.b32.xlu0 %v575_v7, %s1810_s24 }
  0xc4   : > { %646 = vrot.lane.b32.xlu1 %v635_v10, %s1809_s23  ;;  %648 = vrot.lane.b32.xlu0 %v636_v9, %s1809_s23 }
  0xc8   : > { %609 = vrot.lane.b32.xlu1 %v1904_v34, %s1816_s10  ;;  %611 = vrot.lane.b32.xlu0 %v1895_v25, %s1816_s10  ;;  %s2143_s10 = scalar_lea.vmem %s2305_s0, %s1598_s7 }
  0xcc   : > { %650 = vrot.lane.b32.xlu1 %v637_v11, %s1809_s23  ;;  %652 = vrot.lane.b32.xlu0 %v638_v12, %s1809_s23 }
  0xd0   : > { %757 = vperm.xlu1 %1686, %v735_v21   ;;  %752 = vperm.xlu0 %1685, %v734_v22  }
  0xd4   : > { %762 = vperm.xlu1 %1686, %v736_v26   ;;  %767 = vperm.xlu0 %1685, %v737_v29  }
  0xd8   : > { %772 = vperm.xlu1 %1686, %v738_v32   ;;  %777 = vperm.xlu0 %1685, %v739_v36  }
  0xdc   : > { %782 = vperm.xlu1 %1686, %v740_v40   ;;  %787 = vperm.xlu0 %1685, %v741_v41  }
  0xe0   : > { %812 = vperm.xlu1 %1686, %v746_v46   ;;  %817 = vperm.xlu0 %1685, %v747_v47   ;;  %v1695_v46 = vld [vmem:[%s2308_s3 + $0x34] ss:$12 sps:$4 sm:$0xff]  }
  0xe1   : > { %v1694_v47 = vld [vmem:[%s2308_s3 + $0x20] ss:$12 sps:$4 sm:$0xff]  }
  0xe4   : > { %822 = vperm.xlu1 %1686, %v748_v51   ;;  %827 = vperm.xlu0 %1685, %v749_v54   ;;  %v1701_v51 = vld [vmem:[%s2308_s3 + $0x48] ss:$12 sps:$4 sm:$0xff]   ;;  %v1705_v54 = vld [vmem:[%s2308_s3 + $0x60] ss:$12 sps:$4 sm:$0xff]  }
  0xe8   : > { %792 = vperm.xlu1 %1686, %v742_v57   ;;  %797 = vperm.xlu0 %1685, %v743_v60   ;;  %v1709_v57 = vld [vmem:[%s2308_s3 + $0x78] ss:$12 sps:$4 sm:$0xff]   ;;  %v1713_v60 = vld [vmem:[%s2308_s3 + $0x90] ss:$12 sps:$4 sm:$0xff]  }
  0xec   : > { %802 = vperm.xlu1 %1686, %v744_v63   ;;  %807 = vperm.xlu0 %1685, %v745_v3   ;;  %v1717_v63 = vld [vmem:[%s2308_s3 + $0xa8] ss:$12 sps:$4 sm:$0xff]  }
  0xf6   : > { %v383_v16 = vpop.permute.xlu0 %382 }
  0xfa   : > { %v391_v17 = vpop.permute.xlu0 %390  ;;  %v387_v18 = vpop.permute.xlu1 %386 }
  0xfe   : > { %v419_v23 = vpop.permute.xlu1 %418  ;;  %v385_v24 = vpop.permute.xlu0 %384 }
  0xff   : > { %v394_v27 = vsel %vm392_vm9, %v385_v24, %v387_v18  ;;  %v393_v28 = vsel %vm392_vm9, %v383_v16, %v385_v24 }
 0x100   : > { %975 = vmatprep.subr.bf16.mxu1 %v394_v27 }
 0x101   : > { %976 = vmatpush1.bf16.msra.mxu1 %v393_v28 }
 0x102   : > { %v389_v30 = vpop.permute.xlu1 %388  ;;  %v417_v31 = vpop.permute.xlu0 %416 }
 0x103   : > { %v396_v33 = vsel %vm392_vm9, %v389_v30, %v391_v17  ;;  %v395_v35 = vsel %vm392_vm9, %v383_v16, %v389_v30  ;;  %v424_v43 = vsel %vm420_vm10, %v417_v31, %v419_v23  ;;  %v423_v48 = vsel %vm420_vm10, %v411_v15, %v417_v31 }
 0x104   : > { %977 = vmatprep.subr.bf16.mxu1 %v396_v33 }
 0x105   : > { %978 = vmatpush1.bf16.msra.mxu1 %v395_v35 }
 0x106   : > { %v459_v38 = vpop.permute.xlu1 %458  ;;  %979 = vmatprep.subr.bf16.mxu1 %v422_v37  ;;  %v455_v39 = vpop.permute.xlu0 %454 }
 0x109   : > { %980 = vmatpush1.bf16.msra.mxu1 %v421_v42 }
 0x10a   : > { %v497_v44 = vpop.permute.xlu1 %496  ;;  %981 = vmatprep.subr.bf16.mxu1 %v424_v43  ;;  %v463_v45 = vpop.permute.xlu0 %462 }
 0x10d   : > { %982 = vmatpush1.bf16.msra.mxu1 %v423_v48  ;;  %v1697_v48 = vld [vmem:[%s2308_s3 + $0x30] ss:$12 sps:$4 sm:$0xff]  }
 0x10e   : > { %v505_v49 = vpop.permute.xlu1 %504  ;;  %v457_v50 = vpop.permute.xlu0 %456 }
 0x10f   : > { %v466_v52 = vsel %vm464_vm8, %v457_v50, %v459_v38  ;;  %v465_v53 = vsel %vm464_vm8, %v455_v39, %v457_v50  ;;  %v1687_v38 = vld [vmem:[%s2308_s3] ss:$12 sps:$4 sm:$0xff]   ;;  %v1698_v50 = vld [vmem:[%s2308_s3 + $0x38] ss:$12 sps:$4 sm:$0xff]  }
 0x110   : > { %983 = vmatprep.subr.bf16.mxu1 %v466_v52  ;;  %v1703_v52 = vld [vmem:[%s2308_s3 + $0x64] ss:$12 sps:$4 sm:$0xff]  }
 0x111   : > { %984 = vmatpush1.bf16.msra.mxu1 %v465_v53  ;;  %v1702_v53 = vld [vmem:[%s2308_s3 + $0x50] ss:$12 sps:$4 sm:$0xff]  }
 0x112   : > { %v461_v55 = vpop.permute.xlu1 %460  ;;  %v501_v56 = vpop.permute.xlu0 %500 }
 0x113   : > { %v468_v58 = vsel %vm464_vm8, %v461_v55, %v463_v45  ;;  %v467_v59 = vsel %vm464_vm8, %v455_v39, %v461_v55  ;;  %v1691_v39 = vld [vmem:[%s2308_s3 + $0x1c] ss:$12 sps:$4 sm:$0xff]   ;;  %v1693_v45 = vld [vmem:[%s2308_s3 + $0x18] ss:$12 sps:$4 sm:$0xff]  }
 0x114   : > { %985 = vmatprep.subr.bf16.mxu1 %v468_v58  ;;  %v1707_v55 = vld [vmem:[%s2308_s3 + $0x7c] ss:$12 sps:$4 sm:$0xff]   ;;  %v1711_v58 = vld [vmem:[%s2308_s3 + $0x94] ss:$12 sps:$4 sm:$0xff]  }
 0x115   : > { %986 = vmatpush1.bf16.msra.mxu1 %v467_v59  ;;  %v1710_v59 = vld [vmem:[%s2308_s3 + $0x80] ss:$12 sps:$4 sm:$0xff]  }
 0x116   : > { %v499_v61 = vpop.permute.xlu1 %498  ;;  %v542_v62 = vpop.permute.xlu0 %541 }
 0x117   : > { %v508_v0 = vsel %vm506_vm7, %v499_v61, %v501_v56  ;;  %v507_v2 = vsel %vm506_vm7, %v497_v44, %v499_v61  ;;  %v1706_v56 = vld [vmem:[%s2308_s3 + $0x68] ss:$12 sps:$4 sm:$0xff]   ;;  %v1715_v61 = vld [vmem:[%s2308_s3 + $0xac] ss:$12 sps:$4 sm:$0xff]  }
 0x118   : > { %987 = vmatprep.subr.bf16.mxu1 %v508_v0  ;;  %v1718_v0 = vld [vmem:[%s2308_s3 + $0xb0] ss:$12 sps:$4 sm:$0xff]  }
 0x119   : > { %988 = vmatpush1.bf16.msra.mxu1 %v507_v2 }
 0x11a   : > { %v546_v4 = vpop.permute.xlu1 %545  ;;  %v503_v5 = vpop.permute.xlu0 %502 }
 0x11b   : > { %v510_v6 = vsel %vm506_vm7, %v503_v5, %v505_v49  ;;  %v509_v7 = vsel %vm506_vm7, %v497_v44, %v503_v5  ;;  %v1690_v44 = vld [vmem:[%s2308_s3 + $0x8] ss:$12 sps:$4 sm:$0xff]   ;;  %v1699_v49 = vld [vmem:[%s2308_s3 + $0x4c] ss:$12 sps:$4 sm:$0xff]  }
 0x11c   : > { %989 = vmatprep.subr.bf16.mxu1 %v510_v6 }
 0x11d   : > { %990 = vmatpush1.bf16.msra.mxu1 %v509_v7 }
 0x11e   : > { %v582_v8 = vpop.permute.xlu1 %581  ;;  %v548_v9 = vpop.permute.xlu0 %547  ;;  %991 = vmatprep.subr.bf16.mxu1 %v1890_v20 }
 0x121   : > { %992 = vmatpush1.bf16.msra.mxu1 %v1888_v19 }
 0x122   : > { %v588_v10 = vpop.permute.xlu1 %587  ;;  %v586_v11 = vpop.permute.xlu0 %585  ;;  %993 = vmatprep.subr.bf16.mxu1 %v1895_v25 }
 0x125   : > { %994 = vmatpush1.bf16.msra.mxu1 %v1904_v34 }
 0x126   : > { %v608_v12 = vpop.permute.xlu1 %607  ;;  %v544_v13 = vpop.permute.xlu0 %543 }
 0x127   : > { %v552_v14 = vsel %vm481_vm6, %v544_v13, %v546_v4  ;;  %v551_v15 = vsel %vm481_vm6, %v542_v62, %v544_v13  ;;  %v1714_v62 = vld [vmem:[%s2308_s3 + $0x98] ss:$12 sps:$4 sm:$0xff]  }
 0x128   : > { %995 = vmatprep.subr.bf16.mxu1 %v552_v14 }
 0x129   : > { %996 = vmatpush1.bf16.msra.mxu1 %v551_v15 }
 0x12a   : > { %v550_v16 = vpop.permute.xlu1 %549  ;;  %v606_v17 = vpop.permute.xlu0 %605 }
 0x12b   : > { %v554_v20 = vsel %vm481_vm6, %v550_v16, %v546_v4  ;;  %v553_v19 = vsel %vm481_vm6, %v548_v9, %v550_v16  ;;  %v615_v27 = vsel %vm613_vm11, %v606_v17, %v608_v12 }
 0x12c   : > { %997 = vmatprep.subr.bf16.mxu1 %v554_v20 }
 0x12d   : > { %998 = vmatpush1.bf16.msra.mxu1 %v553_v19 }
 0x12e   : > { %v584_v18 = vpop.permute.xlu1 %583  ;;  %v604_v25 = vpop.permute.xlu0 %603 }
 0x12f   : > { %v592_v34 = vsel %vm439_vm5, %v584_v18, %v586_v11  ;;  %v591_v21 = vsel %vm439_vm5, %v582_v8, %v584_v18  ;;  %v614_v32 = vsel %vm613_vm11, %v604_v25, %v606_v17 }
 0x130   : > { %999 = vmatprep.subr.bf16.mxu1 %v592_v34 }
 0x131   : > { %1000 = vmatpush1.bf16.msra.mxu1 %v591_v21 }
 0x132   : > { %v645_v22 = vpop.permute.xlu1 %644  ;;  %v590_v23 = vpop.permute.xlu0 %589 }
 0x133   : > { %v594_v24 = vsel %vm439_vm5, %v590_v23, %v586_v11  ;;  %v593_v26 = vsel %vm439_vm5, %v588_v10, %v590_v23 }
 0x134   : > { %1001 = vmatprep.subr.bf16.mxu1 %v594_v24 }
 0x135   : > { %1002 = vmatpush1.bf16.msra.mxu1 %v593_v26 }
 0x136   : > { %v647_v28 = vpop.permute.xlu1 %646  ;;  %1003 = vmatprep.subr.bf16.mxu1 %v615_v27  ;;  %v649_v29 = vpop.permute.xlu0 %648 }
 0x137   : > { %v655_v30 = vsel %vm367_vm4, %v647_v28, %v649_v29  ;;  %v654_v31 = vsel %vm367_vm4, %v645_v22, %v647_v28 }
 0x138   : > { %1088 = vmatprep.subr.bf16.mxu0 %v655_v30 }
 0x139   : > { %1004 = vmatpush1.bf16.msra.mxu1 %v614_v32  ;;  %1089 = vmatpush1.bf16.msra.mxu0 %v654_v31 }
 0x13a   : > { %v610_v33 = vpop.permute.xlu1 %609  ;;  %v612_v35 = vpop.permute.xlu0 %611 }
 0x13b   : > { %v617_v36 = vsel %vm613_vm11, %v612_v35, %v608_v12  ;;  %v616_v37 = vsel %vm613_vm11, %v610_v33, %v612_v35 }
 0x13c   : > { %1005 = vmatprep.subr.bf16.mxu1 %v617_v36 }
 0x13d   : > { %1006 = vmatpush1.bf16.msra.mxu1 %v616_v37 }
 0x13e   : > { %v651_v40 = vpop.permute.xlu1 %650  ;;  %v653_v41 = vpop.permute.xlu0 %652 }
 0x13f   : > { %v657_v42 = vsel %vm367_vm4, %v653_v41, %v649_v29  ;;  %v656_v43 = vsel %vm367_vm4, %v651_v40, %v653_v41 }
 0x140   : > { %1008 = vmatmul.mubr.bf16.vlgmr.msra.gmra.mrb[0].mxu1 %v1687_v38  ;;  %1090 = vmatprep.subr.bf16.mxu0 %v657_v42 }
 0x141   : > { %1091 = vmatpush1.bf16.msra.mxu0 %v656_v43  ;;  %1017 = vmatprep.mubr.bf16.mxu1 %v1691_v39 }
 0x144   : > { %1588 = vmatmul.mubr.msk.bf16.vlgmr.msra.gmra.mrb[0].mxu0 %vm950_vm12, %v1690_v44 }
 0x145   : > { %1130 = vmatprep.mubr.bf16.mxu0 %v1807_v1 }
 0x148   : > { %1018 = vmatmul.mubr.bf16.gmra.mrb[4].mxu1 %v1693_v45 }
 0x149   : > { %1027 = vmatprep.mubr.bf16.mxu1 %v1695_v46  ;;  %v1201_v46 = vld [vmem:[%s2143_s10] sm:$0xff] }
 0x14c   : > { %1589 = vmatmul.mubr.msk.bf16.gmra.mrb[4].mxu0 %vm950_vm12, %v1694_v47 }
 0x14d   : > { %1140 = vmatprep.mubr.bf16.mxu0 %v1807_v1 }
 0x14f   : > { %v753_v2 = vpop.permute.xlu0 %752  ;;  %v758_v3 = vpop.permute.xlu1 %757 }
 0x150   : > { %1028 = vmatmul.mubr.bf16.gmra.mrb[8].mxu1 %v1697_v48 }
 0x151   : > { %1037 = vmatprep.mubr.bf16.mxu1 %v1699_v49  ;;  %v1202_v49 = vld [vmem:[%s2143_s10 + $0x8] sm:$0xff] }
 0x153   : > { %v763_v10 = vpop.permute.xlu1 %762  ;;  %v768_v17 = vpop.permute.xlu0 %767 }
 0x154   : > { %1590 = vmatmul.mubr.msk.bf16.gmra.mrb[8].mxu0 %vm950_vm12, %v1698_v50 }
 0x155   : > { %1150 = vmatprep.mubr.bf16.mxu0 %v1807_v1 }
 0x157   : > { %v773_v18 = vpop.permute.xlu1 %772  ;;  %v778_v26 = vpop.permute.xlu0 %777 }
 0x158   : > { %1038 = vmatmul.mubr.bf16.gmra.mrb[12].mxu1 %v1701_v51  ;;  %v1203_v51 = vld [vmem:[%s2143_s10 + $0x10] sm:$0xff] }
 0x159   : > { %1047 = vmatprep.mubr.bf16.mxu1 %v1703_v52 }
 0x15b   : > { %v783_v32 = vpop.permute.xlu1 %782  ;;  %v788_v41 = vpop.permute.xlu0 %787 }
 0x15c   : > { %1591 = vmatmul.mubr.msk.bf16.gmra.mrb[12].mxu0 %vm950_vm12, %v1702_v53 }
 0x15d   : > { %1160 = vmatprep.mubr.bf16.mxu0 %v1807_v1 }
 0x15f   : > { %v2148_v48 = vpop.permute.xlu1 %812 }
 0x160   : > { %1048 = vmatmul.mubr.bf16.gmra.mrb[16].mxu1 %v1705_v54 }
 0x161   : > { %1057 = vmatprep.mubr.bf16.mxu1 %v1707_v55 }
 0x164   : > { %1592 = vmatmul.mubr.msk.bf16.gmra.mrb[16].mxu0 %vm950_vm12, %v1706_v56  ;;  %v1204_v56 = vld [vmem:[%s2143_s10 + $0x18] sm:$0xff] }
 0x165   : > { %1170 = vmatprep.mubr.bf16.mxu0 %v1807_v1 }
 0x168   : > { %1058 = vmatmul.mubr.bf16.gmra.mrb[20].mxu1 %v1709_v57 }
 0x169   : > { %1067 = vmatprep.mubr.bf16.mxu1 %v1711_v58 }
 0x16c   : > { %1593 = vmatmul.mubr.msk.bf16.gmra.mrb[20].mxu0 %vm950_vm12, %v1710_v59 }
 0x16d   : > { %1180 = vmatprep.mubr.bf16.mxu0 %v1807_v1 }
 0x170   : > { %1068 = vmatmul.mubr.bf16.gmra.mrb[24].mxu1 %v1713_v60  ;;  %v2153_v60 = vpop.permute.xlu0 %817 }
 0x171   : > { %1077 = vmatprep.mubr.bf16.mxu1 %v1715_v61 }
 0x174   : > { %1594 = vmatmul.mubr.msk.bf16.gmra.mrb[24].mxu0 %vm950_vm12, %v1714_v62 }
 0x175   : > { %1190 = vmatprep.mubr.bf16.mxu0 %v1807_v1 }
 0x178   : > { %1078 = vmatmul.mubr.bf16.gmra.mrb[28].mxu1 %v1717_v63 }
 0x17c   : > { %1595 = vmatmul.mubr.msk.bf16.gmra.mrb[28].mxu0 %vm950_vm12, %v1718_v0 }
 0x213   : > { %v1009_v4 = vpop.f32.mrb[0].mxu1 }
 0x214   : > { %v1011_v5 = vpop.f32.mrb[1].mxu1  ;;  %v1010_v6 = vadd.f32 %v1009_v4, %v753_v2 }
 0x215   : > { %v1013_v7 = vpop.f32.mrb[2].mxu1  ;;  %v1012_v8 = vadd.f32 %v1011_v5, %v753_v2 }
 0x216   : > { %v1015_v9 = vpop.f32.mrb[3].mxu1  ;;  %v1014_v12 = vadd.f32 %v1013_v7, %v758_v3 }
 0x217   : > { %v1122_v11 = vpop.f32.mrb[0].mxu0  ;;  %v1016_v14 = vadd.f32 %v1015_v9, %v758_v3 }
 0x218   : > { %v1123_v13 = vadd.f32 %v1122_v11, %v1010_v6  ;;  %v1124_v1 = vpop.f32.mrb[1].mxu0  ;;  %v2157_v6 = vpop.permute.xlu1 %822  ;;  %v1205_v11 = vld [vmem:[%s2143_s10 + $0x20] sm:$0xff] }
 0x219   : > { %v1125_v15 = vadd.f32 %v1124_v1, %v1012_v8  ;;  %v1126_v16 = vpop.f32.mrb[2].mxu0 }
 0x21a   : > { %v1127_v20 = vadd.f32 %v1126_v16, %v1014_v12  ;;  %v1128_v19 = vpop.f32.mrb[3].mxu0  ;;  %v1233_v55 = vadd.f32 %v1201_v46, %v1123_v13  ;;  %v2161_v16 = vpop.permute.xlu0 %827 }
 0x21b   : > { %v1129_v25 = vadd.f32 %v1128_v19, %v1016_v14  ;;  %v1019_v34 = vpop.f32.mrb[4].mxu1  ;;  %v1234_v61 = vadd.f32 %v1202_v49, %v1125_v15  ;;  %v1206_v14 = vld [vmem:[%s2143_s10 + $0x28] sm:$0xff] }
 0x21c   : > { %v1021_v21 = vpop.f32.mrb[5].mxu1  ;;  %v1020_v22 = vadd.f32 %v1019_v34, %v763_v10  ;;  %v1235_v0 = vadd.f32 %v1203_v51, %v1127_v20  ;;  %v1265_v7 = vmul.f32 0.5, %v1233_v55  ;;  %v1209_v20 = vld [vmem:[%s2143_s10 + $0x40] sm:$0xff] }
 0x21d   : > { %v1022_v23 = vadd.f32 %v1021_v21, %v763_v10  ;;  %v1023_v24 = vpop.f32.mrb[6].mxu1  ;;  %v1236_v4 = vadd.f32 %v1204_v56, %v1129_v25  ;;  %v1266_v10 = vmul.f32 0.5, %v1234_v61 }
 0x21e   : > { %v1025_v27 = vpop.f32.mrb[7].mxu1  ;;  %v1024_v29 = vadd.f32 %v1023_v24, %v768_v17  ;;  %v1267_v1 = vmul.f32 0.5, %v1235_v0  ;;  %1719 = vtanh.f32 %v1265_v7 }
 0x21f   : > { %v1132_v28 = vpop.f32.mrb[4].mxu0  ;;  %v1026_v33 = vadd.f32 %v1025_v27, %v768_v17  ;;  %v1268_v17 = vmul.f32 0.5, %v1236_v4  ;;  %1721 = vtanh.f32 %v1266_v10  ;;  %v1213_v4 = vld [vmem:[%s2143_s10 + $0x60] sm:$0xff]  ;;  %v1214_v10 = vld [vmem:[%s2143_s10 + $0x68] sm:$0xff] }
 0x220   : > { %v1133_v30 = vadd.f32 %v1132_v28, %v1020_v22  ;;  %v1134_v31 = vpop.f32.mrb[5].mxu0  ;;  %1723 = vtanh.f32 %v1267_v1 }
 0x221   : > { %v1135_v35 = vadd.f32 %v1134_v31, %v1022_v23  ;;  %v1136_v36 = vpop.f32.mrb[6].mxu0  ;;  %1725 = vtanh.f32 %v1268_v17 }
 0x222   : > { %v2138_v37 = vadd.f32 %v1136_v36, %v1024_v29  ;;  %v1138_v38 = vpop.f32.mrb[7].mxu0  ;;  %v1237_v34 = vadd.f32 %v1205_v11, %v1133_v30  ;;  %v793_v29 = vpop.permute.xlu1 %792 }
 0x223   : > { %v2145_v39 = vadd.f32 %v1138_v38, %v1026_v33  ;;  %v1029_v40 = vpop.f32.mrb[8].mxu1  ;;  %v1238_v24 = vadd.f32 %v1206_v14, %v1135_v35  ;;  %v1207_v38 = vld [vmem:[%s2143_s10 + $0x30] sm:$0xff] }
 0x224   : > { %v1031_v42 = vpop.f32.mrb[9].mxu1  ;;  %v1030_v43 = vadd.f32 %v1029_v40, %v773_v18  ;;  %v1269_v36 = vmul.f32 0.5, %v1237_v34 }
 0x225   : > { %v1032_v44 = vadd.f32 %v1031_v42, %v773_v18  ;;  %v1033_v45 = vpop.f32.mrb[10].mxu1 }
 0x226   : > { %v1035_v47 = vpop.f32.mrb[11].mxu1  ;;  %v1034_v52 = vadd.f32 %v1033_v45, %v778_v26  ;;  %1727 = vtanh.f32 %v1269_v36  ;;  %v803_v11 = vpop.permute.xlu1 %802 }
 0x227   : > { %v1142_v50 = vpop.f32.mrb[8].mxu0  ;;  %v1036_v57 = vadd.f32 %v1035_v47, %v778_v26  ;;  %v1210_v26 = vld [vmem:[%s2143_s10 + $0x48] sm:$0xff]  ;;  %v1208_v47 = vld [vmem:[%s2143_s10 + $0x38] sm:$0xff] }
 0x228   : > { %v1143_v53 = vadd.f32 %v1142_v50, %v1030_v43  ;;  %v1144_v54 = vpop.f32.mrb[9].mxu0  ;;  %v798_v43 = vpop.permute.xlu0 %797  ;;  %v1212_v50 = vld [vmem:[%s2143_s10 + $0x58] sm:$0xff] }
 0x229   : > { %v1145_v58 = vadd.f32 %v1144_v54, %v1032_v44  ;;  %v1146_v59 = vpop.f32.mrb[10].mxu0  ;;  %v1270_v44 = vmul.f32 0.5, %v1238_v24 }
 0x22a   : > { %v1147_v62 = vadd.f32 %v1146_v59, %v1034_v52  ;;  %v1148_v63 = vpop.f32.mrb[11].mxu0  ;;  %v1241_v31 = vadd.f32 %v1209_v20, %v1143_v53  ;;  %v1239_v52 = vadd.f32 %v1207_v38, %v2138_v37 }
 0x22b   : > { %v2155_v2 = vadd.f32 %v1148_v63, %v1036_v57  ;;  %v1039_v3 = vpop.f32.mrb[12].mxu1  ;;  %v1242_v40 = vadd.f32 %v1210_v26, %v1145_v58  ;;  %1729 = vtanh.f32 %v1270_v44  ;;  %v1240_v63 = vadd.f32 %v1208_v47, %v2145_v39 }
 0x22c   : > { %v1041_v5 = vpop.f32.mrb[13].mxu1  ;;  %v1040_v8 = vadd.f32 %v1039_v3, %v783_v32  ;;  %v1297_v49 = vmul.f32 0.5, %v1241_v31  ;;  %v808_v39 = vpop.permute.xlu0 %807  ;;  %v1271_v14 = vmul.f32 0.5, %v1239_v52 }
 0x22d   : > { %v1043_v9 = vpop.f32.mrb[14].mxu1  ;;  %v1042_v12 = vadd.f32 %v1041_v5, %v783_v32  ;;  %v1298_v57 = vmul.f32 0.5, %v1242_v40  ;;  %v1244_v0 = vadd.f32 %v1212_v50, %v2155_v2  ;;  %v1217_v40 = vld [vmem:[%s2143_s10 + $0x80] sm:$0xff] }
 0x22e   : > { %v1045_v13 = vpop.f32.mrb[15].mxu1  ;;  %v1044_v19 = vadd.f32 %v1043_v9, %v788_v41  ;;  %1731 = vtanh.f32 %v1297_v49 }
 0x22f   : > { %v1152_v15 = vpop.f32.mrb[12].mxu0  ;;  %v1046_v21 = vadd.f32 %v1045_v13, %v788_v41  ;;  %v1211_v41 = vld [vmem:[%s2143_s10 + $0x50] sm:$0xff]  ;;  %1733 = vtanh.f32 %v1298_v57  ;;  %v1300_v17 = vmul.f32 0.5, %v1244_v0 }
 0x230   : > { %v2164_v18 = vadd.f32 %v1152_v15, %v1040_v8  ;;  %v1154_v25 = vpop.f32.mrb[13].mxu0  ;;  %v1243_v53 = vadd.f32 %v1211_v41, %v1147_v62  ;;  %v1720_v62 = vpop.eup %1719  ;;  %v1272_v15 = vmul.f32 0.5, %v1240_v63 }
 0x231   : > { %v2166_v22 = vadd.f32 %v1154_v25, %v1042_v12  ;;  %v1156_v23 = vpop.f32.mrb[14].mxu0  ;;  %v1722_v8 = vpop.eup %1721  ;;  %v1281_v34 = vadd.f32 1.0, %v1720_v62 }
 0x232   : > { %v2169_v27 = vadd.f32 %v1156_v23, %v1044_v19  ;;  %v1158_v28 = vpop.f32.mrb[15].mxu0  ;;  %v1299_v9 = vmul.f32 0.5, %v1243_v53  ;;  %v1724_v13 = vpop.eup %1723  ;;  %v1245_v20 = vadd.f32 %v1213_v4, %v2164_v18  ;;  %v1215_v19 = vld [vmem:[%s2143_s10 + $0x70] sm:$0xff] }
 0x233   : > { %v2171_v32 = vadd.f32 %v1158_v28, %v1046_v21  ;;  %v1049_v30 = vpop.f32.mrb[16].mxu1  ;;  %v1726_v1 = vpop.eup %1725  ;;  %v1282_v21 = vadd.f32 1.0, %v1722_v8  ;;  %v1246_v23 = vadd.f32 %v1214_v10, %v2166_v22  ;;  %v1283_v28 = vadd.f32 1.0, %v1724_v13 }
 0x234   : > { %v1051_v33 = vpop.f32.mrb[17].mxu1  ;;  %v1050_v42 = vadd.f32 %v1049_v30, %v793_v29  ;;  %1735 = vtanh.f32 %v1299_v9  ;;  %v1284_v36 = vadd.f32 1.0, %v1726_v1  ;;  %v1247_v38 = vadd.f32 %v1215_v19, %v2169_v27 }
 0x235   : > { %v1053_v35 = vpop.f32.mrb[18].mxu1  ;;  %v1052_v45 = vadd.f32 %v1051_v33, %v793_v29  ;;  %v1216_v29 = vld [vmem:[%s2143_s10 + $0x78] sm:$0xff]  ;;  %1737 = vtanh.f32 %v1300_v17 }
 0x236   : > { %v1055_v46 = vpop.f32.mrb[19].mxu1  ;;  %v1054_v54 = vadd.f32 %v1053_v35, %v798_v43  ;;  %v1301_v35 = vmul.f32 0.5, %v1245_v20  ;;  %v1248_v47 = vadd.f32 %v1216_v29, %v2171_v32  ;;  %1739 = vtanh.f32 %v1271_v14  ;;  %v1226_v20 = vld [vmem:[%s2143_s10 + $0xc8] sm:$0xff] }
 0x237   : > { %v1162_v51 = vpop.f32.mrb[16].mxu0  ;;  %v1056_v58 = vadd.f32 %v1055_v46, %v798_v43  ;;  %v1302_v46 = vmul.f32 0.5, %v1246_v23  ;;  %1741 = vtanh.f32 %v1272_v15  ;;  %v1303_v57 = vmul.f32 0.5, %v1247_v38 }
 0x238   : > { %v1163_v55 = vadd.f32 %v1162_v51, %v1050_v42  ;;  %v1164_v56 = vpop.f32.mrb[17].mxu0  ;;  %v2209_v32 = vmul.f32 0.5, %v1284_v36  ;;  %1743 = vtanh.f32 %v1301_v35  ;;  %v1304_v4 = vmul.f32 0.5, %v1248_v47  ;;  %v1222_v47 = vld [vmem:[%s2143_s10 + $0xa8] sm:$0xff] }
 0x239   : > { %v2178_v59 = vadd.f32 %v1164_v56, %v1052_v45  ;;  %v1166_v61 = vpop.f32.mrb[18].mxu0  ;;  %v1728_v45 = vpop.eup %1727  ;;  %v2205_v56 = vmul.f32 0.5, %v1282_v21  ;;  %1745 = vtanh.f32 %v1302_v46 }
 0x23a   : > { %v2182_v3 = vadd.f32 %v1166_v61, %v1054_v54  ;;  %v1168_v37 = vpop.f32.mrb[19].mxu0  ;;  %v1730_v50 = vpop.eup %1729  ;;  %v1249_v51 = vadd.f32 %v1217_v40, %v1163_v55  ;;  %v2203_v54 = vmul.f32 0.5, %v1281_v34  ;;  %v2207_v61 = vmul.f32 0.5, %v1283_v28  ;;  %v1218_v55 = vld [vmem:[%s2143_s10 + $0x88] sm:$0xff]  ;;  %v1228_v28 = vld [vmem:[%s2143_s10 + $0xd8] sm:$0xff] }
 0x23b   : > { %v2185_v5 = vadd.f32 %v1168_v37, %v1056_v58  ;;  %v1059_v7 = vpop.f32.mrb[20].mxu1  ;;  %v1732_v53 = vpop.eup %1731  ;;  %v2211_v63 = vadd.f32 1.0, %v1728_v45  ;;  %v2214_v62 = vadd.f32 1.0, %v1730_v50  ;;  %1747 = vtanh.f32 %v1303_v57  ;;  %v1223_v57 = vld [vmem:[%s2143_s10 + $0xb0] sm:$0xff] }
 0x23c   : > { %v1061_v12 = vpop.f32.mrb[21].mxu1  ;;  %v1060_v24 = vadd.f32 %v1059_v7, %v803_v11  ;;  %v1734_v37 = vpop.eup %1733  ;;  %v1219_v7 = vld [vmem:[%s2143_s10 + $0x90] sm:$0xff]  ;;  %v1313_v10 = vadd.f32 1.0, %v1732_v53  ;;  %v1250_v14 = vadd.f32 %v1218_v55, %v2178_v59  ;;  %1749 = vtanh.f32 %v1304_v4 }
 0x23d   : > { %v1063_v2 = vpop.f32.mrb[22].mxu1  ;;  %v1062_v31 = vadd.f32 %v1061_v12, %v803_v11  ;;  %v1329_v11 = vmul.f32 0.5, %v1249_v51  ;;  %v1220_v12 = vld [vmem:[%s2143_s10 + $0x98] sm:$0xff]  ;;  %v1314_v21 = vadd.f32 1.0, %v1734_v37  ;;  %v1251_v23 = vadd.f32 %v1219_v7, %v2182_v3 }
 0x23e   : > { %v1065_v25 = vpop.f32.mrb[23].mxu1  ;;  %v1064_v30 = vadd.f32 %v1063_v2, %v808_v39  ;;  %v1225_v2 = vld [vmem:[%s2143_s10 + $0xc0] sm:$0xff]  ;;  %v1736_v34 = vpop.eup %1735  ;;  %v1252_v29 = vadd.f32 %v1220_v12, %v2185_v5  ;;  %v1224_v7 = vld [vmem:[%s2143_s10 + $0xb8] sm:$0xff] }
 0x23f   : > { %v1172_v26 = vpop.f32.mrb[20].mxu0  ;;  %v1066_v18 = vadd.f32 %v1065_v25, %v808_v39  ;;  %v1227_v25 = vld [vmem:[%s2143_s10 + $0xd0] sm:$0xff]  ;;  %1751 = vtanh.f32 %v1329_v11  ;;  %v1315_v3 = vadd.f32 1.0, %v1736_v34  ;;  %v1322_v45 = vmul.f32 0.5, %v1314_v21  ;;  %v1370_v21 = vld [vmem:[%s2243_s12 + $0x8] sm:$0xff] }
 0x240   : > { %v1174_v33 = vpop.f32.mrb[21].mxu0  ;;  %v2194_v41 = vadd.f32 %v1172_v26, %v1060_v24  ;;  %v1331_v46 = vmul.f32 0.5, %v1251_v23  ;;  %v1332_v53 = vmul.f32 0.5, %v1252_v29 }
 0x241   : > { %v1176_v42 = vpop.f32.mrb[22].mxu0  ;;  %v2196_v43 = vadd.f32 %v1174_v33, %v1062_v31  ;;  %v2229_v33 = vmul.f32 0.5, %v1313_v10  ;;  %v1323_v23 = vmul.f32 0.5, %v1315_v3 }
 0x242   : > { %v2198_v22 = vadd.f32 %v1176_v42, %v1064_v30  ;;  %v1178_v44 = vpop.f32.mrb[23].mxu0  ;;  %v1221_v42 = vld [vmem:[%s2143_s10 + $0xa0] sm:$0xff] }
 0x243   : > { %v2201_v49 = vadd.f32 %v1178_v44, %v1066_v18  ;;  %v1069_v27 = vpop.f32.mrb[24].mxu1  ;;  %v1330_v18 = vmul.f32 0.5, %v1250_v14  ;;  %v1253_v4 = vadd.f32 %v1221_v42, %v2194_v41  ;;  %v1254_v12 = vadd.f32 %v1222_v47, %v2196_v43 }
 0x244   : > { %v1071_v52 = vpop.f32.mrb[25].mxu1  ;;  %v1070_v8 = vadd.f32 %v1069_v27, %v2148_v48  ;;  %v1255_v41 = vadd.f32 %v1223_v57, %v2198_v22  ;;  %v1371_v22 = vld [vmem:[%s2243_s12 + $0x10] sm:$0xff] }
 0x245   : > { %v1073_v58 = vpop.f32.mrb[26].mxu1  ;;  %v1072_v13 = vadd.f32 %v1071_v52, %v2148_v48  ;;  %v1256_v34 = vadd.f32 %v1224_v7, %v2201_v49  ;;  %v1334_v29 = vmul.f32 0.5, %v1254_v12 }
 0x246   : > { %v1075_v0 = vpop.f32.mrb[27].mxu1  ;;  %v1074_v39 = vadd.f32 %v1073_v58, %v2153_v60 }
 0x247   : > { %v1182_v9 = vpop.f32.mrb[24].mxu0  ;;  %v1076_v15 = vadd.f32 %v1075_v0, %v2153_v60  ;;  %v1738_v60 = vpop.eup %1737  ;;  %v1229_v0 = vld [vmem:[%s2143_s10 + $0xe0] sm:$0xff] }
 0x248   : > { %v1184_v1 = vpop.f32.mrb[25].mxu0  ;;  %v1183_v17 = vadd.f32 %v1182_v9, %v1070_v8  ;;  %v1740_v5 = vpop.eup %1739  ;;  %v1316_v52 = vadd.f32 1.0, %v1738_v60  ;;  %v1372_v60 = vld [vmem:[%s2243_s12 + $0x18] sm:$0xff] }
 0x249   : > { %v1186_v19 = vpop.f32.mrb[26].mxu0  ;;  %v1185_v24 = vadd.f32 %v1184_v1, %v1072_v13  ;;  %v2234_v51 = vpop.eup %1741  ;;  %v1231_v1 = vld [vmem:[%s2143_s10 + $0xf0] sm:$0xff] }
 0x24a   : > { %v1187_v48 = vadd.f32 %v1186_v19, %v1074_v39  ;;  %v1188_v26 = vpop.f32.mrb[27].mxu0  ;;  %v1257_v31 = vadd.f32 %v1225_v2, %v1183_v17  ;;  %v1744_v37 = vpop.eup %1743 }
 0x24b   : > { %v1189_v59 = vadd.f32 %v1188_v26, %v1076_v15  ;;  %v1079_v30 = vpop.f32.mrb[28].mxu1  ;;  %v1258_v36 = vadd.f32 %v1226_v20, %v1185_v24  ;;  %v1746_v11 = vpop.eup %1745  ;;  %v1232_v20 = vld [vmem:[%s2143_s10 + $0xf8] sm:$0xff]  ;;  %v1333_v24 = vmul.f32 0.5, %v1253_v4  ;;  %v1317_v3 = vadd.f32 1.0, %v1744_v37 }
 0x24c   : > { %v1259_v38 = vadd.f32 %v1227_v25, %v1187_v48  ;;  %v1081_v40 = vpop.f32.mrb[29].mxu1  ;;  %1753 = vtanh.f32 %v1257_v31  ;;  %v1080_v27 = vadd.f32 %v1079_v30, %v2157_v6  ;;  %v1748_v19 = vpop.eup %1747  ;;  %v1369_v25 = vld [vmem:[%s2243_s12] sm:$0xff]  ;;  %v1287_v30 = vadd.f32 1.0, %v1740_v5  ;;  %v1376_v37 = vld [vmem:[%s2243_s12 + $0x38] sm:$0xff] }
 0x24d   : > { %v1260_v35 = vadd.f32 %v1228_v28, %v1189_v59  ;;  %v1083_v44 = vpop.f32.mrb[30].mxu1  ;;  %1755 = vtanh.f32 %v1258_v36  ;;  %v1082_v58 = vadd.f32 %v1081_v40, %v2157_v6  ;;  %v1230_v6 = vld [vmem:[%s2143_s10 + $0xe8] sm:$0xff]  ;;  %v1750_v26 = vpop.eup %1749  ;;  %v1324_v28 = vmul.f32 0.5, %v1316_v52 }
 0x24e   : > { %v1085_v50 = vpop.f32.mrb[31].mxu1  ;;  %1757 = vtanh.f32 %v1259_v38  ;;  %v1084_v8 = vadd.f32 %v1083_v44, %v2161_v16  ;;  %v2258_v59 = vpop.eup %1751  ;;  %v1377_v49 = vmul.f32 %v1369_v25, %v2229_v33  ;;  %v1335_v36 = vmul.f32 0.5, %v1255_v41 }
 0x24f   : > { %v1192_v55 = vpop.f32.mrb[28].mxu0  ;;  %1759 = vtanh.f32 %v1260_v35  ;;  %v1086_v13 = vadd.f32 %v1085_v50, %v2161_v16  ;;  %v1378_v40 = vmul.f32 %v1370_v21, %v1322_v45  ;;  %v1379_v35 = vmul.f32 %v1371_v22, %v1323_v23  ;;  %v1373_v50 = vld [vmem:[%s2243_s12 + $0x20] sm:$0xff] }
 0x250   : > { %v1193_v9 = vadd.f32 %v1192_v55, %v1080_v27  ;;  %v1194_v10 = vpop.f32.mrb[29].mxu0  ;;  %1761 = vtanh.f32 %v1330_v18  ;;  %v1336_v18 = vmul.f32 0.5, %v1256_v34  ;;  %v1318_v44 = vadd.f32 1.0, %v1746_v11  ;;  %v1374_v55 = vld [vmem:[%s2243_s12 + $0x28] sm:$0xff] }
 0x251   : > { %v1195_v39 = vadd.f32 %v1194_v10, %v1082_v58  ;;  %v1196_v2 = vpop.f32.mrb[30].mxu0  ;;  %1763 = vtanh.f32 %v1331_v46  ;;  %v1380_v33 = vmul.f32 %v1372_v60, %v1324_v28  ;;  %v1319_v45 = vadd.f32 1.0, %v1748_v19 }
 0x252   : > { %v1261_v14 = vadd.f32 %v1229_v0, %v1193_v9  ;;  %v1197_v15 = vadd.f32 %v1196_v2, %v1084_v8  ;;  %v1198_v17 = vpop.f32.mrb[31].mxu0  ;;  %1765 = vtanh.f32 %v1332_v53  ;;  %v1320_v52 = vadd.f32 1.0, %v1750_v26  ;;  %v1375_v0 = vld [vmem:[%s2243_s12 + $0x30] sm:$0xff] }
 0x253   : > { %v1262_v43 = vadd.f32 %v1230_v6, %v1195_v39  ;;  %v1199_v16 = vadd.f32 %v1198_v17, %v1086_v13  ;;  %v1325_v58 = vmul.f32 0.5, %v1317_v3  ;;  %v1288_v8 = vadd.f32 1.0, %v2234_v51 }
 0x254   : > { %1767 = vtanh.f32 %v1261_v14  ;;  %v1263_v48 = vadd.f32 %v1231_v1, %v1197_v15  ;;  %v1326_v9 = vmul.f32 0.5, %v1318_v44  ;;  %v1293_v6 = vmul.f32 0.5, %v2211_v63 }
 0x255   : > { %1769 = vtanh.f32 %v1262_v43  ;;  %v1264_v31 = vadd.f32 %v1232_v20, %v1199_v16  ;;  %v1327_v11 = vmul.f32 0.5, %v1319_v45  ;;  %v1294_v39 = vmul.f32 0.5, %v2214_v62 }
 0x256   : > { %1771 = vtanh.f32 %v1263_v48  ;;  %v1754_v38 = vpop.eup %1753  ;;  %v1295_v51 = vmul.f32 0.5, %v1287_v30  ;;  %v1381_v1 = vmul.f32 %v1373_v50, %v1325_v58  ;;  %v1296_v15 = vmul.f32 0.5, %v1288_v8 }
 0x257   : > { %1773 = vtanh.f32 %v1264_v31  ;;  %v1756_v42 = vpop.eup %1755  ;;  %v1385_v46 = vmul.f32 %v1754_v38, %v2203_v54  ;;  %v1382_v63 = vmul.f32 %v1374_v55, %v1326_v9  ;;  %v1383_v19 = vmul.f32 %v1375_v0, %v1327_v11 }
 0x258   : > { %1775 = vtanh.f32 %v1333_v24  ;;  %v1758_v5 = vpop.eup %1757  ;;  %v1386_v47 = vmul.f32 %v1756_v42, %v2205_v56  ;;  %v1345_v25 = vadd.f32 1.0, %v2258_v59 }
 0x259   : > { %1777 = vtanh.f32 %v1334_v29  ;;  %v1760_v27 = vpop.eup %1759  ;;  %v1393_v53 = vadd.f32 %v1385_v46, %v1377_v49  ;;  %v1387_v54 = vmul.f32 %v1758_v5, %v2207_v61 }
 0x25a   : > { %1779 = vtanh.f32 %v1335_v36  ;;  %v1762_v57 = vpop.eup %1761  ;;  %v1394_v4 = vadd.f32 %v1386_v47, %v1378_v40  ;;  %v1388_v7 = vmul.f32 %v1760_v27, %v2209_v32  ;;  %v1328_v32 = vmul.f32 0.5, %v1320_v52 }
 0x25b   : > { %1781 = vtanh.f32 %v1336_v18  ;;  %v1764_v56 = vpop.eup %1763  ;;  %1401 = vst [vmem:[%s2267_s15] sm:$0xff] %v1393_v53  ;;  %v1395_v10 = vadd.f32 %v1387_v54, %v1379_v35  ;;  %v1346_v21 = vadd.f32 1.0, %v1762_v57  ;;  %v1353_v30 = vmul.f32 0.5, %v1345_v25 }
 0x25c   : > { %1783 = vtanh.f32 %v1393_v53  ;;  %v1766_v61 = vpop.eup %1765  ;;  %1402 = vst [vmem:[%s2267_s15 + $0x8] sm:$0xff] %v1394_v4  ;;  %v1396_v12 = vadd.f32 %v1388_v7, %v1380_v33  ;;  %v1384_v16 = vmul.f32 %v1376_v37, %v1328_v32  ;;  %v1347_v26 = vadd.f32 1.0, %v1764_v56 }
 0x25d   : > { %1785 = vtanh.f32 %v1394_v4  ;;  %1403 = vst [vmem:[%s2267_s15 + $0x10] sm:$0xff] %v1395_v10  ;;  %v1348_v29 = vadd.f32 1.0, %v1766_v61  ;;  %v1354_v60 = vmul.f32 0.5, %v1346_v21 }
 0x25e   : > { %v1768_v13 = vpop.eup %1767  ;;  %1787 = vtanh.f32 %v1395_v10  ;;  %1404 = vst [vmem:[%s2267_s15 + $0x18] sm:$0xff] %v1396_v12  ;;  %v1355_v38 = vmul.f32 0.5, %v1347_v26 }
 0x25f   : > { %v1770_v2 = vpop.eup %1769  ;;  %1789 = vtanh.f32 %v1396_v12  ;;  %v1389_v41 = vmul.f32 %v1768_v13, %v1293_v6  ;;  %v1356_v18 = vmul.f32 0.5, %v1348_v29 }
 0x260   : > { %v1772_v14 = vpop.eup %1771  ;;  %v1390_v17 = vmul.f32 %v1770_v2, %v1294_v39 }
 0x261   : > { %v1774_v20 = vpop.eup %1773  ;;  %v1397_v62 = vadd.f32 %v1389_v41, %v1381_v1  ;;  %v1391_v34 = vmul.f32 %v1772_v14, %v1295_v51 }
 0x262   : > { %v1776_v43 = vpop.eup %1775  ;;  %v1398_v23 = vadd.f32 %v1390_v17, %v1382_v63  ;;  %v1392_v24 = vmul.f32 %v1774_v20, %v1296_v15 }
 0x263   : > { %v1778_v48 = vpop.eup %1777  ;;  %1405 = vst [vmem:[%s2267_s15 + $0x20] sm:$0xff] %v1397_v62  ;;  %1791 = vtanh.f32 %v1397_v62  ;;  %v1399_v22 = vadd.f32 %v1391_v34, %v1383_v19  ;;  %v1349_v42 = vadd.f32 1.0, %v1776_v43 }
 0x264   : > { %v1780_v28 = vpop.eup %1779  ;;  %1406 = vst [vmem:[%s2267_s15 + $0x28] sm:$0xff] %v1398_v23  ;;  %1793 = vtanh.f32 %v1398_v23  ;;  %v1400_v31 = vadd.f32 %v1392_v24, %v1384_v16  ;;  %v1350_v46 = vadd.f32 1.0, %v1778_v48 }
 0x265   : > { %v1782_v59 = vpop.eup %1781  ;;  %1407 = vst [vmem:[%s2267_s15 + $0x30] sm:$0xff] %v1399_v22  ;;  %1795 = vtanh.f32 %v1399_v22  ;;  %v1351_v33 = vadd.f32 1.0, %v1780_v28  ;;  %v1357_v27 = vmul.f32 0.5, %v1349_v42 }
 0x266   : > { %v1784_v49 = vpop.eup %1783  ;;  %1408 = vst [vmem:[%s2267_s15 + $0x38] sm:$0xff] %v1400_v31  ;;  %1797 = vtanh.f32 %v1400_v31  ;;  %v1352_v47 = vadd.f32 1.0, %v1782_v59  ;;  %v1358_v52 = vmul.f32 0.5, %v1350_v46 }
 0x267   : > { %v1786_v36 = vpop.eup %1785  ;;  %v1417_v40 = vmul.f32 %v1784_v49, %v1353_v30  ;;  %v1359_v54 = vmul.f32 0.5, %v1351_v33 }
 0x268   : > { %v1788_v3 = vpop.eup %1787  ;;  %v1418_v35 = vmul.f32 %v1786_v36, %v1354_v60  ;;  %v1360_v55 = vmul.f32 0.5, %v1352_v47 }
 0x269   : > { %v1790_v44 = vpop.eup %1789  ;;  %1425 = vst [vmem:[%s2291_s18] sm:$0xff] %v1417_v40  ;;  %v1419_v5 = vmul.f32 %v1788_v3, %v1355_v38 }
 0x26a   : > { %1426 = vst [vmem:[%s2291_s18 + $0x8] sm:$0xff] %v1418_v35  ;;  %v1420_v45 = vmul.f32 %v1790_v44, %v1356_v18 }
 0x26b   : > { %1427 = vst [vmem:[%s2291_s18 + $0x10] sm:$0xff] %v1419_v5 }
 0x26c   : > { %1428 = vst [vmem:[%s2291_s18 + $0x18] sm:$0xff] %v1420_v45 }
 0x26d   : > { %v1792_v50 = vpop.eup %1791 }
 0x26e   : > { %v1794_v53 = vpop.eup %1793  ;;  %v1421_v57 = vmul.f32 %v1792_v50, %v1357_v27 }
 0x26f   : > { %v1796_v58 = vpop.eup %1795  ;;  %v1422_v0 = vmul.f32 %v1794_v53, %v1358_v52 }
 0x270   : > { %v1798_v37 = vpop.eup %1797  ;;  %1429 = vst [vmem:[%s2291_s18 + $0x20] sm:$0xff] %v1421_v57  ;;  %v1423_v4 = vmul.f32 %v1796_v58, %v1359_v54 }
 0x271   : > { %1430 = vst [vmem:[%s2291_s18 + $0x28] sm:$0xff] %v1422_v0  ;;  %v1424_v7 = vmul.f32 %v1798_v37, %v1360_v55 }
 0x272   : > { %1431 = vst [vmem:[%s2291_s18 + $0x30] sm:$0xff] %v1423_v4 }
 0x273   : > { %1432 = vst [vmem:[%s2291_s18 + $0x38] sm:$0xff] %v1424_v7 }
 0x274 PF: > { %s17_s21 = sadd.s32 1, %s1805_s21  }
 0x275   : > { %p14_p4 = scmp.ge.s32.totalorder %s17_s21, 4  }
 0x277   :  { %16 = sbr.rel (!%p14_p4) target bundleno = 1 (0x1), region = 88 }

</bundles_post_ra>
